<compile_context>
chip_gen: v6e
topology: v6e:2x2x1
jax: 0.10.0
libtpu: 0.0.40
codegen_flags: <defaults>
</compile_context>

<pallas_src>
import jax
import jax.numpy as jnp
from jax.experimental import pallas as pl
from jax.experimental.pallas import tpu as pltpu

LANE = 128
SUBLANE = 8


def _round_up(x, m):
    return ((x + m - 1) // m) * m


def _pick_tile(total, unit, cap):
    """Largest multiple of `unit` that divides `total` and is <= cap (unit | total)."""
    n = total // unit
    for k in range(min(n, max(1, cap // unit)), 0, -1):
        if n % k == 0:
            return unit * k
    return unit


def _nbytes(shape, dtype):
    n = 1
    for d in shape:
        n *= int(d)
    return n * jnp.dtype(dtype).itemsize


def _vmem_limit(bytes_needed):
    # Actual need (x2 headroom for double-buffering / temporaries), floor 32 MiB,
    # capped at 64 MiB so it is valid on v7x as well.
    return int(min(64 << 20, max(32 << 20, 2 * bytes_needed + (4 << 20))))


# ---------------------------------------------------------------------------
# Kernel 1: ReLU + whole-sequence input-gate matmul (Phase 1) + GRU recurrence
# ---------------------------------------------------------------------------
def gru_seq_kernel(x_ref, h0_ref, wih_ref, whh_ref, bih_ref, bhhn_ref,
                   hs_ref, hfin_ref, gi_scr):
    """Shapes (R = S*Bp, HP = hidden padded to 128 lanes):
      x_ref   : (R, E)      embedded tokens, time-major, batch padded to Bp
      h0_ref  : (Bp, HP)    initial hidden (pad lanes/rows zero)        [f32]
      wih_ref : (E, 3*HP)   input->gates, gate g in cols [g*HP, g*HP+H) [matmul dtype]
      whh_ref : (HP, 3*HP)  hidden->gates, same layout, pad rows zero   [matmul dtype]
      bih_ref : (1, 3*HP)   b_ih (+ b_hh for r,z folded in)             [f32]
      bhhn_ref: (1, HP)     b_hh of the n gate (stays inside r*(...))   [f32]
      hs_ref  : (R, HP)     per-step hidden states (output)             [matmul dtype]
      hfin_ref: (Bp, HP)    final hidden (output)                       [f32]
      gi_scr  : (R, 3*HP)   scratch: precomputed input-gate activations [matmul dtype]
    """
    R, _ = x_ref.shape
    Bp, HP = h0_ref.shape
    S = R // Bp

    # ---- Phase 1: everything input-dependent hoisted off the recurrence. ----
    x = jnp.maximum(x_ref[...], 0.0)                              # ReLU (f32)
    gi = jnp.dot(x.astype(wih_ref.dtype), wih_ref[...],
                 preferred_element_type=jnp.float32) + bih_ref[...]
    gi_scr[...] = gi.astype(gi_scr.dtype)

    # ---- Phase 2: serial GRU recurrence (h carried in vregs, f32). ----------
    whh = whh_ref[...]          # hoisted: stays resident across all steps
    bhh_n = bhhn_ref[...]       # (1, HP), hoisted
    # TODO(synk): keep W_hh truly weight-stationary (pltpu.matmul_push_rhs /
    # matmul_acc_lhs / matmul_pop) to avoid re-staging the RHS every step.

    def step(t, h):
        row = pl.multiple_of(t * Bp, Bp)
        gi_t = gi_scr[pl.ds(row, Bp), :].astype(jnp.float32)      # (Bp, 3*HP)
        gh = jnp.dot(h.astype(whh.dtype), whh,
                     preferred_element_type=jnp.float32)          # (Bp, 3*HP)
        # Gate slices sit at 128-lane boundaries -> no lane shuffles.
        r = jax.nn.sigmoid(gi_t[:, 0:HP] + gh[:, 0:HP])
        z = jax.nn.sigmoid(gi_t[:, HP:2 * HP] + gh[:, HP:2 * HP])
        n = jnp.tanh(gi_t[:, 2 * HP:] + r * (gh[:, 2 * HP:] + bhh_n))
        h_new = (1.0 - z) * n + z * h
        hs_ref[pl.ds(row, Bp), :] = h_new.astype(hs_ref.dtype)    # off critical chain
        return h_new

    h_final = jax.lax.fori_loop(0, S, step, h0_ref[...], unroll=min(S, 8))
    hfin_ref[...] = h_final


# ---------------------------------------------------------------------------
# Kernel 2: projection tile + streaming max/logsumexp across vocab tiles
# ---------------------------------------------------------------------------
def proj_lse_kernel(hs_ref, wlin_ref, blin_ref, logits_ref, lse_ref, m_scr, l_scr):
    o = pl.program_id(1)

    @pl.when(o == 0)
    def _():
        m_scr[...] = jnp.full_like(m_scr, -jnp.inf)
        l_scr[...] = jnp.zeros_like(l_scr)

    logits = jnp.dot(hs_ref[...], wlin_ref[...],
                     preferred_element_type=jnp.float32) + blin_ref[...]
    logits_ref[...] = logits

    m_prev = m_scr[...]
    m_new = jnp.maximum(m_prev, jnp.max(logits, axis=-1, keepdims=True))
    l_scr[...] = (l_scr[...] * jnp.exp(m_prev - m_new)
                  + jnp.sum(jnp.exp(logits - m_new), axis=-1, keepdims=True))
    m_scr[...] = m_new

    @pl.when(o == pl.num_programs(1) - 1)
    def _():
        lse_ref[...] = m_scr[...] + jnp.log(l_scr[...])


# ---------------------------------------------------------------------------
# Kernel 3: lane-dense log-softmax normalization (y = logits - lse)
# ---------------------------------------------------------------------------
def lsm_norm_kernel(logits_ref, lse_ref, y_ref):
    y_ref[...] = logits_ref[...] - lse_ref[...]


# ---------------------------------------------------------------------------
# Wrapper (PyTorch-equivalent forward)
# ---------------------------------------------------------------------------
def decoder_forward(tokens, prev_hidden, params, *, matmul_dtype=jnp.bfloat16):
    """tokens: (B, S) int32; prev_hidden: (1, B, H) f32
    returns (y: (B, S, O) log-probs f32, hidden: (1, B, H) f32)."""
    emb, w_ih, w_hh, b_ih, b_hh, w_lin, b_lin = (
        params["emb"], params["w_ih"], params["w_hh"],
        params["b_ih"], params["b_hh"], params["w_lin"], params["b_lin"])

    B, S = tokens.shape
    H = w_hh.shape[1]
    O, E = emb.shape

    Bp = _round_up(B, SUBLANE)                 # batch padded to sublane multiple
    HP = _round_up(max(H, LANE), LANE)
    OP = _round_up(max(O, LANE), LANE)
    R = S * Bp
    md = jnp.dtype(matmul_dtype)

    # ---- XLA glue: embedding gather, batch pad, time-major flatten. ---------
    x_emb = jnp.transpose(jnp.take(emb, tokens, axis=0), (1, 0, 2))   # (S, B, E)
    x_p = (jnp.zeros((S, Bp, E), jnp.float32)
           .at[:, :B, :].set(x_emb).reshape(R, E))                    # (R, E)
    h0 = jnp.zeros((Bp, HP), jnp.float32).at[:B, :H].set(prev_hidden[0])

    # ---- Gate-aligned padded weights: gate g occupies cols [g*HP, g*HP+H). --
    def gate_cols(w_t):      # (K, 3H) -> (K, 3*HP)
        out = jnp.zeros((w_t.shape[0], 3 * HP), jnp.float32)
        for g in range(3):
            out = out.at[:, g * HP:g * HP + H].set(w_t[:, g * H:(g + 1) * H])
        return out

    def gate_vec(v):         # (3H,) -> (1, 3*HP)
        out = jnp.zeros((3 * HP,), jnp.float32)
        for g in range(3):
            out = out.at[g * HP:g * HP + H].set(v[g * H:(g + 1) * H])
        return out.reshape(1, 3 * HP)

    wih_p = gate_cols(w_ih.T).astype(md)                               # (E, 3HP)
    whh_p = (jnp.zeros((HP, 3 * HP), jnp.float32)
             .at[:H, :].set(gate_cols(w_hh.T))).astype(md)             # (HP, 3HP)

    # b_ih (all gates) + b_hh (r,z) folded into the precomputed GI bias;
    # the n-gate b_hh must stay inside r*(...), passed separately.
    bhh_rz = jnp.concatenate([b_hh[:2 * H], jnp.zeros((H,), jnp.float32)])
    bih_p = gate_vec(b_ih + bhh_rz)                                    # (1, 3HP) f32
    bhhn_p = jnp.zeros((1, HP), jnp.float32).at[0, :H].set(b_hh[2 * H:])

    wlin_p = (jnp.zeros((HP, OP), jnp.float32)
              .at[:H, :O].set(w_lin.T)).astype(md)                     # (HP, OP)
    blin_p = jnp.full((1, OP), -1e30, jnp.float32).at[0, :O].set(b_lin)

    vmem = pl.BlockSpec(memory_space=pltpu.MemorySpace.VMEM)

    # ---- Kernel 1: ReLU + input-gate matmul + GRU recurrence. ---------------
    k1_bytes = (_nbytes((R, E), jnp.float32) + _nbytes((Bp, HP), jnp.float32)
                + _nbytes((E, 3 * HP), md) + _nbytes((HP, 3 * HP), md)
                + _nbytes((1, 3 * HP), jnp.float32) + _nbytes((1, HP), jnp.float32)
                + _nbytes((R, HP), md) + _nbytes((Bp, HP), jnp.float32)
                + _nbytes((R, 3 * HP), md))
    hs, h_fin = pl.pallas_call(
        gru_seq_kernel,
        out_shape=(jax.ShapeDtypeStruct((R, HP), md),
                   jax.ShapeDtypeStruct((Bp, HP), jnp.float32)),
        in_specs=[vmem] * 6,
        out_specs=(vmem, vmem),
        scratch_shapes=[pltpu.VMEM((R, 3 * HP), md)],
        compiler_params=pltpu.CompilerParams(vmem_limit_bytes=_vmem_limit(k1_bytes)),
    )(x_p, h0, wih_p, whh_p, bih_p, bhhn_p)

    # ---- Kernel 2 + 3: vocab-tiled projection + streaming log-softmax. ------
    TR = _pick_tile(R, Bp, 512)           # row tile (multiple of Bp)
    if md.itemsize == 2 and TR % 16 != 0:
        TR = R                            # keep bf16 sublane packing aligned
    TO = _pick_tile(OP, LANE, 2048)       # vocab tile (multiple of 128)
    grid = (R // TR, OP // TO)

    k2_bytes = (2 * (_nbytes((TR, HP), md) + _nbytes((HP, TO), md)
                     + _nbytes((1, TO), jnp.float32)
                     + _nbytes((TR, TO), jnp.float32)
                     + _nbytes((TR, 1), jnp.float32))
                + 2 * _nbytes((TR, 1), jnp.float32))
    logits, lse = pl.pallas_call(
        proj_lse_kernel,
        out_shape=(jax.ShapeDtypeStruct((R, OP), jnp.float32),
                   jax.ShapeDtypeStruct((R, 1), jnp.float32)),
        grid_spec=pltpu.PrefetchScalarGridSpec(
            num_scalar_prefetch=0, grid=grid,
            in_specs=[pl.BlockSpec((TR, HP), lambda r, o: (r, 0)),
                      pl.BlockSpec((HP, TO), lambda r, o: (0, o)),
                      pl.BlockSpec((1, TO), lambda r, o: (0, o))],
            out_specs=[pl.BlockSpec((TR, TO), lambda r, o: (r, o)),
                       pl.BlockSpec((TR, 1), lambda r, o: (r, 0))],
            scratch_shapes=[pltpu.VMEM((TR, 1), jnp.float32),
                            pltpu.VMEM((TR, 1), jnp.float32)]),
        compiler_params=pltpu.CompilerParams(
            dimension_semantics=("parallel", "arbitrary"),
            vmem_limit_bytes=_vmem_limit(k2_bytes)),
    )(hs, wlin_p, blin_p)

    k3_bytes = 2 * (2 * _nbytes((TR, TO), jnp.float32) + _nbytes((TR, 1), jnp.float32))
    y_flat = pl.pallas_call(
        lsm_norm_kernel,
        out_shape=jax.ShapeDtypeStruct((R, OP), jnp.float32),
        grid_spec=pltpu.PrefetchScalarGridSpec(
            num_scalar_prefetch=0, grid=grid,
            in_specs=[pl.BlockSpec((TR, TO), lambda r, o: (r, o)),
                      pl.BlockSpec((TR, 1), lambda r, o: (r, 0))],
            out_specs=pl.BlockSpec((TR, TO), lambda r, o: (r, o))),
        compiler_params=pltpu.CompilerParams(
            dimension_semantics=("parallel", "parallel"),
            vmem_limit_bytes=_vmem_limit(k3_bytes)),
    )(logits, lse)

    # ---- XLA glue: unpad + back to batch_first convention. ------------------
    y = jnp.transpose(y_flat.reshape(S, Bp, OP)[:, :B, :O], (1, 0, 2))  # (B, S, O)
    hidden = h_fin[None, :B, :H]                                        # (1, B, H)
    return y, hidden


# ---------------------------------------------------------------------------
# Pure-JAX reference (torch semantics) and parameter init
# ---------------------------------------------------------------------------
def decoder_reference(tokens, prev_hidden, params):
    emb, w_ih, w_hh, b_ih, b_hh, w_lin, b_lin = (
        params["emb"], params["w_ih"], params["w_hh"],
        params["b_ih"], params["b_hh"], params["w_lin"], params["b_lin"])
    H = w_hh.shape[1]

    x = jnp.maximum(jnp.take(emb, tokens, axis=0), 0.0)   # (B, S, E)
    x = jnp.transpose(x, (1, 0, 2))                       # (S, B, E)
    h = prev_hidden[0]

    def step(h, x_t):
        gi = x_t @ w_ih.T + b_ih
        gh = h @ w_hh.T + b_hh
        i_r, i_z, i_n = gi[:, :H], gi[:, H:2 * H], gi[:, 2 * H:]
        h_r, h_z, h_n = gh[:, :H], gh[:, H:2 * H], gh[:, 2 * H:]
        r = jax.nn.sigmoid(i_r + h_r)
        z = jax.nn.sigmoid(i_z + h_z)
        n = jnp.tanh(i_n + r * h_n)
        h_new = (1.0 - z) * n + z * h
        return h_new, h_new

    h_final, outs = jax.lax.scan(step, h, x)              # outs: (S, B, H)
    logits = outs @ w_lin.T + b_lin                       # (S, B, O)
    y = jax.nn.log_softmax(logits, axis=-1)
    return jnp.transpose(y, (1, 0, 2)), h_final[None]


def init_params(key, output_size, embed_size, hidden_size):
    ks = jax.random.split(key, 7)
    k = 1.0 / jnp.sqrt(hidden_size)
    return {
        "emb":   jax.random.normal(ks[0], (output_size, embed_size), jnp.float32),
        "w_ih":  jax.random.uniform(ks[1], (3 * hidden_size, embed_size), jnp.float32, -k, k),
        "w_hh":  jax.random.uniform(ks[2], (3 * hidden_size, hidden_size), jnp.float32, -k, k),
        "b_ih":  jax.random.uniform(ks[3], (3 * hidden_size,), jnp.float32, -k, k),
        "b_hh":  jax.random.uniform(ks[4], (3 * hidden_size,), jnp.float32, -k, k),
        "w_lin": jax.random.uniform(ks[5], (output_size, hidden_size), jnp.float32, -k, k),
        "b_lin": jax.random.uniform(ks[6], (output_size,), jnp.float32, -k, k),
    }


if __name__ == "__main__":
    OUTPUT_SIZE = 16   # vocab size
    EMBED_SIZE = 32
    HIDDEN_SIZE = 32
    BATCH = 2
    SEQ = 8

    key = jax.random.PRNGKey(0)
    k_tok, k_h, k_par = jax.random.split(key, 3)

    tokens = jax.random.randint(k_tok, (BATCH, SEQ), 0, OUTPUT_SIZE, dtype=jnp.int32)
    prev_hidden = jax.random.normal(k_h, (1, BATCH, HIDDEN_SIZE), jnp.float32)
    params = init_params(k_par, OUTPUT_SIZE, EMBED_SIZE, HIDDEN_SIZE)

    y_ref, h_ref = decoder_reference(tokens, prev_hidden, params)

    # Strict numerical check with f32 matmul operands.
    y32, h32 = decoder_forward(tokens, prev_hidden, params, matmul_dtype=jnp.float32)
    jax.block_until_ready((y32, h32))
    assert y32.shape == (BATCH, SEQ, OUTPUT_SIZE)
    assert h32.shape == (1, BATCH, HIDDEN_SIZE)
    assert jnp.allclose(y32, y_ref, rtol=1e-4, atol=1e-4)
    assert jnp.allclose(h32, h_ref, rtol=1e-4, atol=1e-4)

    # Production config: bf16 matmul operands with f32 accumulation.
    y16, h16 = decoder_forward(tokens, prev_hidden, params, matmul_dtype=jnp.bfloat16)
    jax.block_until_ready((y16, h16))
    assert jnp.allclose(y16, y_ref, rtol=1e-1, atol=1e-1)
    assert jnp.allclose(h16, h_ref, rtol=1e-1, atol=1e-1)

    print("KERNEL_OK")
</pallas_src>

<mosaic_0001>
module attributes {stable_mosaic.version = 11 : i64} {
  func.func @gru_seq_kernel(%arg0: memref<64x32xf32, #tpu.memory_space<vmem>>, %arg1: memref<8x128xf32, #tpu.memory_space<vmem>>, %arg2: memref<32x384xf32, #tpu.memory_space<vmem>>, %arg3: memref<128x384xf32, #tpu.memory_space<vmem>>, %arg4: memref<1x384xf32, #tpu.memory_space<vmem>>, %arg5: memref<1x128xf32, #tpu.memory_space<vmem>>, %arg6: memref<64x128xf32, #tpu.memory_space<vmem>>, %arg7: memref<8x128xf32, #tpu.memory_space<vmem>>, %arg8: memref<64x384xf32, #tpu.memory_space<vmem>>) attributes {dimension_semantics = [], scalar_prefetch = 0 : i64, scratch_operands = 1 : i64, tpu.core_type = #tpu.core_type<tc>} {
    %c0 = arith.constant 0 : index
    %c0_0 = arith.constant 0 : index
    %0 = vector.load %arg0[%c0, %c0_0] : memref<64x32xf32, #tpu.memory_space<vmem>>, vector<64x32xf32>
    %cst = arith.constant 0.000000e+00 : f32
    %1 = vector.broadcast %cst : f32 to vector<64x32xf32>
    %2 = arith.maximumf %0, %1 : vector<64x32xf32>
    %c0_1 = arith.constant 0 : index
    %c0_2 = arith.constant 0 : index
    %3 = vector.load %arg2[%c0_1, %c0_2] : memref<32x384xf32, #tpu.memory_space<vmem>>, vector<32x384xf32>
    %cst_3 = arith.constant dense<0.000000e+00> : vector<64x384xf32>
    %4 = tpu.matmul %2, %3, %cst_3 {dimension_numbers = #tpu.dot_dimension_numbers<[1], [0], [0], [1], [0, 0, 1, 1], [], []>} : vector<64x32xf32>, vector<32x384xf32>, vector<64x384xf32> -> vector<64x384xf32>
    %c0_4 = arith.constant 0 : index
    %c0_5 = arith.constant 0 : index
    %5 = vector.load %arg4[%c0_4, %c0_5] : memref<1x384xf32, #tpu.memory_space<vmem>>, vector<1x384xf32>
    %6 = vector.broadcast %5 : vector<1x384xf32> to vector<64x384xf32>
    %7 = arith.addf %4, %6 : vector<64x384xf32>
    %c0_6 = arith.constant 0 : index
    %c0_7 = arith.constant 0 : index
    %8 = vector.load %arg8[%c0_6, %c0_7] : memref<64x384xf32, #tpu.memory_space<vmem>>, vector<64x384xf32>
    tpu.vector_store %arg8[%c0_6, %c0_7], %7 {strides = array<i32>} : memref<64x384xf32, #tpu.memory_space<vmem>>, vector<64x384xf32>,
    %c0_8 = arith.constant 0 : index
    %c0_9 = arith.constant 0 : index
    %9 = vector.load %arg3[%c0_8, %c0_9] : memref<128x384xf32, #tpu.memory_space<vmem>>, vector<128x384xf32>
    %c0_10 = arith.constant 0 : index
    %c0_11 = arith.constant 0 : index
    %10 = vector.load %arg5[%c0_10, %c0_11] : memref<1x128xf32, #tpu.memory_space<vmem>>, vector<1x128xf32>
    %c0_12 = arith.constant 0 : index
    %c0_13 = arith.constant 0 : index
    %11 = vector.load %arg1[%c0_12, %c0_13] : memref<8x128xf32, #tpu.memory_space<vmem>>, vector<8x128xf32>
    %c0_i32 = arith.constant 0 : i32
    %c8_i32 = arith.constant 8 : i32
    %12 = arith.muli %c0_i32, %c8_i32 : i32
    %13 = tpu.assume_multiple %12, 8 : i32
    %14 = arith.index_cast %13 : i32 to index
    %c0_14 = arith.constant 0 : index
    %15 = vector.load %arg8[%14, %c0_14] : memref<64x384xf32, #tpu.memory_space<vmem>>, vector<8x384xf32>
    %cst_15 = arith.constant dense<0.000000e+00> : vector<8x384xf32>
    %16 = tpu.matmul %11, %9, %cst_15 {dimension_numbers = #tpu.dot_dimension_numbers<[1], [0], [0], [1], [0, 0, 1, 1], [], []>} : vector<8x128xf32>, vector<128x384xf32>, vector<8x384xf32> -> vector<8x384xf32>
    %17 = vector.extract_strided_slice %15 {offsets = [0, 0], sizes = [8, 128], strides = [1, 1]} : vector<8x384xf32> to vector<8x128xf32>
    %18 = vector.extract_strided_slice %16 {offsets = [0, 0], sizes = [8, 128], strides = [1, 1]} : vector<8x384xf32> to vector<8x128xf32>
    %19 = arith.addf %17, %18 : vector<8x128xf32>
    %20 = arith.negf %19 : vector<8x128xf32>
    %21 = math.exp %20 : vector<8x128xf32>
    %cst_16 = arith.constant 1.000000e+00 : f32
    %22 = vector.broadcast %cst_16 : f32 to vector<8x128xf32>
    %23 = arith.addf %22, %21 : vector<8x128xf32>
    %24 = arith.divf %22, %23 : vector<8x128xf32>
    %25 = vector.extract_strided_slice %15 {offsets = [0, 128], sizes = [8, 128], strides = [1, 1]} : vector<8x384xf32> to vector<8x128xf32>
    %26 = vector.extract_strided_slice %16 {offsets = [0, 128], sizes = [8, 128], strides = [1, 1]} : vector<8x384xf32> to vector<8x128xf32>
    %27 = arith.addf %25, %26 : vector<8x128xf32>
    %28 = arith.negf %27 : vector<8x128xf32>
    %29 = math.exp %28 : vector<8x128xf32>
    %cst_17 = arith.constant 1.000000e+00 : f32
    %30 = vector.broadcast %cst_17 : f32 to vector<8x128xf32>
    %31 = arith.addf %30, %29 : vector<8x128xf32>
    %32 = arith.divf %30, %31 : vector<8x128xf32>
    %33 = vector.extract_strided_slice %15 {offsets = [0, 256], sizes = [8, 128], strides = [1, 1]} : vector<8x384xf32> to vector<8x128xf32>
    %34 = vector.extract_strided_slice %16 {offsets = [0, 256], sizes = [8, 128], strides = [1, 1]} : vector<8x384xf32> to vector<8x128xf32>
    %35 = vector.broadcast %10 : vector<1x128xf32> to vector<8x128xf32>
    %36 = arith.addf %34, %35 : vector<8x128xf32>
    %37 = arith.mulf %24, %36 : vector<8x128xf32>
    %38 = arith.addf %33, %37 : vector<8x128xf32>
    %39 = math.tanh %38 : vector<8x128xf32>
    %cst_18 = arith.constant 1.000000e+00 : f32
    %40 = vector.broadcast %cst_18 : f32 to vector<8x128xf32>
    %41 = arith.subf %40, %32 : vector<8x128xf32>
    %42 = arith.mulf %41, %39 : vector<8x128xf32>
    %43 = arith.mulf %32, %11 : vector<8x128xf32>
    %44 = arith.addf %42, %43 : vector<8x128xf32>
    %45 = arith.index_cast %13 : i32 to index
    %c0_19 = arith.constant 0 : index
    %46 = vector.load %arg6[%45, %c0_19] : memref<64x128xf32, #tpu.memory_space<vmem>>, vector<8x128xf32>
    tpu.vector_store %arg6[%45, %c0_19], %44 {strides = array<i32>} : memref<64x128xf32, #tpu.memory_space<vmem>>, vector<8x128xf32>,
    %c1_i32 = arith.constant 1 : i32
    %c8_i32_20 = arith.constant 8 : i32
    %47 = arith.muli %c1_i32, %c8_i32_20 : i32
    %48 = tpu.assume_multiple %47, 8 : i32
    %49 = arith.index_cast %48 : i32 to index
    %c0_21 = arith.constant 0 : index
    %50 = vector.load %arg8[%49, %c0_21] : memref<64x384xf32, #tpu.memory_space<vmem>>, vector<8x384xf32>
    %cst_22 = arith.constant dense<0.000000e+00> : vector<8x384xf32>
    %51 = tpu.matmul %44, %9, %cst_22 {dimension_numbers = #tpu.dot_dimension_numbers<[1], [0], [0], [1], [0, 0, 1, 1], [], []>} : vector<8x128xf32>, vector<128x384xf32>, vector<8x384xf32> -> vector<8x384xf32>
    %52 = vector.extract_strided_slice %50 {offsets = [0, 0], sizes = [8, 128], strides = [1, 1]} : vector<8x384xf32> to vector<8x128xf32>
    %53 = vector.extract_strided_slice %51 {offsets = [0, 0], sizes = [8, 128], strides = [1, 1]} : vector<8x384xf32> to vector<8x128xf32>
    %54 = arith.addf %52, %53 : vector<8x128xf32>
    %55 = arith.negf %54 : vector<8x128xf32>
    %56 = math.exp %55 : vector<8x128xf32>
    %cst_23 = arith.constant 1.000000e+00 : f32
    %57 = vector.broadcast %cst_23 : f32 to vector<8x128xf32>
    %58 = arith.addf %57, %56 : vector<8x128xf32>
    %59 = arith.divf %57, %58 : vector<8x128xf32>
    %60 = vector.extract_strided_slice %50 {offsets = [0, 128], sizes = [8, 128], strides = [1, 1]} : vector<8x384xf32> to vector<8x128xf32>
    %61 = vector.extract_strided_slice %51 {offsets = [0, 128], sizes = [8, 128], strides = [1, 1]} : vector<8x384xf32> to vector<8x128xf32>
    %62 = arith.addf %60, %61 : vector<8x128xf32>
    %63 = arith.negf %62 : vector<8x128xf32>
    %64 = math.exp %63 : vector<8x128xf32>
    %cst_24 = arith.constant 1.000000e+00 : f32
    %65 = vector.broadcast %cst_24 : f32 to vector<8x128xf32>
    %66 = arith.addf %65, %64 : vector<8x128xf32>
    %67 = arith.divf %65, %66 : vector<8x128xf32>
    %68 = vector.extract_strided_slice %50 {offsets = [0, 256], sizes = [8, 128], strides = [1, 1]} : vector<8x384xf32> to vector<8x128xf32>
    %69 = vector.extract_strided_slice %51 {offsets = [0, 256], sizes = [8, 128], strides = [1, 1]} : vector<8x384xf32> to vector<8x128xf32>
    %70 = vector.broadcast %10 : vector<1x128xf32> to vector<8x128xf32>
    %71 = arith.addf %69, %70 : vector<8x128xf32>
    %72 = arith.mulf %59, %71 : vector<8x128xf32>
    %73 = arith.addf %68, %72 : vector<8x128xf32>
    %74 = math.tanh %73 : vector<8x128xf32>
    %cst_25 = arith.constant 1.000000e+00 : f32
    %75 = vector.broadcast %cst_25 : f32 to vector<8x128xf32>
    %76 = arith.subf %75, %67 : vector<8x128xf32>
    %77 = arith.mulf %76, %74 : vector<8x128xf32>
    %78 = arith.mulf %67, %44 : vector<8x128xf32>
    %79 = arith.addf %77, %78 : vector<8x128xf32>
    %80 = arith.index_cast %48 : i32 to index
    %c0_26 = arith.constant 0 : index
    %81 = vector.load %arg6[%80, %c0_26] : memref<64x128xf32, #tpu.memory_space<vmem>>, vector<8x128xf32>
    tpu.vector_store %arg6[%80, %c0_26], %79 {strides = array<i32>} : memref<64x128xf32, #tpu.memory_space<vmem>>, vector<8x128xf32>,
    %c2_i32 = arith.constant 2 : i32
    %c8_i32_27 = arith.constant 8 : i32
    %82 = arith.muli %c2_i32, %c8_i32_27 : i32
    %83 = tpu.assume_multiple %82, 8 : i32
    %84 = arith.index_cast %83 : i32 to index
    %c0_28 = arith.constant 0 : index
    %85 = vector.load %arg8[%84, %c0_28] : memref<64x384xf32, #tpu.memory_space<vmem>>, vector<8x384xf32>
    %cst_29 = arith.constant dense<0.000000e+00> : vector<8x384xf32>
    %86 = tpu.matmul %79, %9, %cst_29 {dimension_numbers = #tpu.dot_dimension_numbers<[1], [0], [0], [1], [0, 0, 1, 1], [], []>} : vector<8x128xf32>, vector<128x384xf32>, vector<8x384xf32> -> vector<8x384xf32>
    %87 = vector.extract_strided_slice %85 {offsets = [0, 0], sizes = [8, 128], strides = [1, 1]} : vector<8x384xf32> to vector<8x128xf32>
    %88 = vector.extract_strided_slice %86 {offsets = [0, 0], sizes = [8, 128], strides = [1, 1]} : vector<8x384xf32> to vector<8x128xf32>
    %89 = arith.addf %87, %88 : vector<8x128xf32>
    %90 = arith.negf %89 : vector<8x128xf32>
    %91 = math.exp %90 : vector<8x128xf32>
    %cst_30 = arith.constant 1.000000e+00 : f32
    %92 = vector.broadcast %cst_30 : f32 to vector<8x128xf32>
    %93 = arith.addf %92, %91 : vector<8x128xf32>
    %94 = arith.divf %92, %93 : vector<8x128xf32>
    %95 = vector.extract_strided_slice %85 {offsets = [0, 128], sizes = [8, 128], strides = [1, 1]} : vector<8x384xf32> to vector<8x128xf32>
    %96 = vector.extract_strided_slice %86 {offsets = [0, 128], sizes = [8, 128], strides = [1, 1]} : vector<8x384xf32> to vector<8x128xf32>
    %97 = arith.addf %95, %96 : vector<8x128xf32>
    %98 = arith.negf %97 : vector<8x128xf32>
    %99 = math.exp %98 : vector<8x128xf32>
    %cst_31 = arith.constant 1.000000e+00 : f32
    %100 = vector.broadcast %cst_31 : f32 to vector<8x128xf32>
    %101 = arith.addf %100, %99 : vector<8x128xf32>
    %102 = arith.divf %100, %101 : vector<8x128xf32>
    %103 = vector.extract_strided_slice %85 {offsets = [0, 256], sizes = [8, 128], strides = [1, 1]} : vector<8x384xf32> to vector<8x128xf32>
    %104 = vector.extract_strided_slice %86 {offsets = [0, 256], sizes = [8, 128], strides = [1, 1]} : vector<8x384xf32> to vector<8x128xf32>
    %105 = vector.broadcast %10 : vector<1x128xf32> to vector<8x128xf32>
    %106 = arith.addf %104, %105 : vector<8x128xf32>
    %107 = arith.mulf %94, %106 : vector<8x128xf32>
    %108 = arith.addf %103, %107 : vector<8x128xf32>
    %109 = math.tanh %108 : vector<8x128xf32>
    %cst_32 = arith.constant 1.000000e+00 : f32
    %110 = vector.broadcast %cst_32 : f32 to vector<8x128xf32>
    %111 = arith.subf %110, %102 : vector<8x128xf32>
    %112 = arith.mulf %111, %109 : vector<8x128xf32>
    %113 = arith.mulf %102, %79 : vector<8x128xf32>
    %114 = arith.addf %112, %113 : vector<8x128xf32>
    %115 = arith.index_cast %83 : i32 to index
    %c0_33 = arith.constant 0 : index
    %116 = vector.load %arg6[%115, %c0_33] : memref<64x128xf32, #tpu.memory_space<vmem>>, vector<8x128xf32>
    tpu.vector_store %arg6[%115, %c0_33], %114 {strides = array<i32>} : memref<64x128xf32, #tpu.memory_space<vmem>>, vector<8x128xf32>,
    %c3_i32 = arith.constant 3 : i32
    %c8_i32_34 = arith.constant 8 : i32
    %117 = arith.muli %c3_i32, %c8_i32_34 : i32
    %118 = tpu.assume_multiple %117, 8 : i32
    %119 = arith.index_cast %118 : i32 to index
    %c0_35 = arith.constant 0 : index
    %120 = vector.load %arg8[%119, %c0_35] : memref<64x384xf32, #tpu.memory_space<vmem>>, vector<8x384xf32>
    %cst_36 = arith.constant dense<0.000000e+00> : vector<8x384xf32>
    %121 = tpu.matmul %114, %9, %cst_36 {dimension_numbers = #tpu.dot_dimension_numbers<[1], [0], [0], [1], [0, 0, 1, 1], [], []>} : vector<8x128xf32>, vector<128x384xf32>, vector<8x384xf32> -> vector<8x384xf32>
    %122 = vector.extract_strided_slice %120 {offsets = [0, 0], sizes = [8, 128], strides = [1, 1]} : vector<8x384xf32> to vector<8x128xf32>
    %123 = vector.extract_strided_slice %121 {offsets = [0, 0], sizes = [8, 128], strides = [1, 1]} : vector<8x384xf32> to vector<8x128xf32>
    %124 = arith.addf %122, %123 : vector<8x128xf32>
    %125 = arith.negf %124 : vector<8x128xf32>
    %126 = math.exp %125 : vector<8x128xf32>
    %cst_37 = arith.constant 1.000000e+00 : f32
    %127 = vector.broadcast %cst_37 : f32 to vector<8x128xf32>
    %128 = arith.addf %127, %126 : vector<8x128xf32>
    %129 = arith.divf %127, %128 : vector<8x128xf32>
    %130 = vector.extract_strided_slice %120 {offsets = [0, 128], sizes = [8, 128], strides = [1, 1]} : vector<8x384xf32> to vector<8x128xf32>
    %131 = vector.extract_strided_slice %121 {offsets = [0, 128], sizes = [8, 128], strides = [1, 1]} : vector<8x384xf32> to vector<8x128xf32>
    %132 = arith.addf %130, %131 : vector<8x128xf32>
    %133 = arith.negf %132 : vector<8x128xf32>
    %134 = math.exp %133 : vector<8x128xf32>
    %cst_38 = arith.constant 1.000000e+00 : f32
    %135 = vector.broadcast %cst_38 : f32 to vector<8x128xf32>
    %136 = arith.addf %135, %134 : vector<8x128xf32>
    %137 = arith.divf %135, %136 : vector<8x128xf32>
    %138 = vector.extract_strided_slice %120 {offsets = [0, 256], sizes = [8, 128], strides = [1, 1]} : vector<8x384xf32> to vector<8x128xf32>
    %139 = vector.extract_strided_slice %121 {offsets = [0, 256], sizes = [8, 128], strides = [1, 1]} : vector<8x384xf32> to vector<8x128xf32>
    %140 = vector.broadcast %10 : vector<1x128xf32> to vector<8x128xf32>
    %141 = arith.addf %139, %140 : vector<8x128xf32>
    %142 = arith.mulf %129, %141 : vector<8x128xf32>
    %143 = arith.addf %138, %142 : vector<8x128xf32>
    %144 = math.tanh %143 : vector<8x128xf32>
    %cst_39 = arith.constant 1.000000e+00 : f32
    %145 = vector.broadcast %cst_39 : f32 to vector<8x128xf32>
    %146 = arith.subf %145, %137 : vector<8x128xf32>
    %147 = arith.mulf %146, %144 : vector<8x128xf32>
    %148 = arith.mulf %137, %114 : vector<8x128xf32>
    %149 = arith.addf %147, %148 : vector<8x128xf32>
    %150 = arith.index_cast %118 : i32 to index
    %c0_40 = arith.constant 0 : index
    %151 = vector.load %arg6[%150, %c0_40] : memref<64x128xf32, #tpu.memory_space<vmem>>, vector<8x128xf32>
    tpu.vector_store %arg6[%150, %c0_40], %149 {strides = array<i32>} : memref<64x128xf32, #tpu.memory_space<vmem>>, vector<8x128xf32>,
    %c4_i32 = arith.constant 4 : i32
    %c8_i32_41 = arith.constant 8 : i32
    %152 = arith.muli %c4_i32, %c8_i32_41 : i32
    %153 = tpu.assume_multiple %152, 8 : i32
    %154 = arith.index_cast %153 : i32 to index
    %c0_42 = arith.constant 0 : index
    %155 = vector.load %arg8[%154, %c0_42] : memref<64x384xf32, #tpu.memory_space<vmem>>, vector<8x384xf32>
    %cst_43 = arith.constant dense<0.000000e+00> : vector<8x384xf32>
    %156 = tpu.matmul %149, %9, %cst_43 {dimension_numbers = #tpu.dot_dimension_numbers<[1], [0], [0], [1], [0, 0, 1, 1], [], []>} : vector<8x128xf32>, vector<128x384xf32>, vector<8x384xf32> -> vector<8x384xf32>
    %157 = vector.extract_strided_slice %155 {offsets = [0, 0], sizes = [8, 128], strides = [1, 1]} : vector<8x384xf32> to vector<8x128xf32>
    %158 = vector.extract_strided_slice %156 {offsets = [0, 0], sizes = [8, 128], strides = [1, 1]} : vector<8x384xf32> to vector<8x128xf32>
    %159 = arith.addf %157, %158 : vector<8x128xf32>
    %160 = arith.negf %159 : vector<8x128xf32>
    %161 = math.exp %160 : vector<8x128xf32>
    %cst_44 = arith.constant 1.000000e+00 : f32
    %162 = vector.broadcast %cst_44 : f32 to vector<8x128xf32>
    %163 = arith.addf %162, %161 : vector<8x128xf32>
    %164 = arith.divf %162, %163 : vector<8x128xf32>
    %165 = vector.extract_strided_slice %155 {offsets = [0, 128], sizes = [8, 128], strides = [1, 1]} : vector<8x384xf32> to vector<8x128xf32>
    %166 = vector.extract_strided_slice %156 {offsets = [0, 128], sizes = [8, 128], strides = [1, 1]} : vector<8x384xf32> to vector<8x128xf32>
    %167 = arith.addf %165, %166 : vector<8x128xf32>
    %168 = arith.negf %167 : vector<8x128xf32>
    %169 = math.exp %168 : vector<8x128xf32>
    %cst_45 = arith.constant 1.000000e+00 : f32
    %170 = vector.broadcast %cst_45 : f32 to vector<8x128xf32>
    %171 = arith.addf %170, %169 : vector<8x128xf32>
    %172 = arith.divf %170, %171 : vector<8x128xf32>
    %173 = vector.extract_strided_slice %155 {offsets = [0, 256], sizes = [8, 128], strides = [1, 1]} : vector<8x384xf32> to vector<8x128xf32>
    %174 = vector.extract_strided_slice %156 {offsets = [0, 256], sizes = [8, 128], strides = [1, 1]} : vector<8x384xf32> to vector<8x128xf32>
    %175 = vector.broadcast %10 : vector<1x128xf32> to vector<8x128xf32>
    %176 = arith.addf %174, %175 : vector<8x128xf32>
    %177 = arith.mulf %164, %176 : vector<8x128xf32>
    %178 = arith.addf %173, %177 : vector<8x128xf32>
    %179 = math.tanh %178 : vector<8x128xf32>
    %cst_46 = arith.constant 1.000000e+00 : f32
    %180 = vector.broadcast %cst_46 : f32 to vector<8x128xf32>
    %181 = arith.subf %180, %172 : vector<8x128xf32>
    %182 = arith.mulf %181, %179 : vector<8x128xf32>
    %183 = arith.mulf %172, %149 : vector<8x128xf32>
    %184 = arith.addf %182, %183 : vector<8x128xf32>
    %185 = arith.index_cast %153 : i32 to index
    %c0_47 = arith.constant 0 : index
    %186 = vector.load %arg6[%185, %c0_47] : memref<64x128xf32, #tpu.memory_space<vmem>>, vector<8x128xf32>
    tpu.vector_store %arg6[%185, %c0_47], %184 {strides = array<i32>} : memref<64x128xf32, #tpu.memory_space<vmem>>, vector<8x128xf32>,
    %c5_i32 = arith.constant 5 : i32
    %c8_i32_48 = arith.constant 8 : i32
    %187 = arith.muli %c5_i32, %c8_i32_48 : i32
    %188 = tpu.assume_multiple %187, 8 : i32
    %189 = arith.index_cast %188 : i32 to index
    %c0_49 = arith.constant 0 : index
    %190 = vector.load %arg8[%189, %c0_49] : memref<64x384xf32, #tpu.memory_space<vmem>>, vector<8x384xf32>
    %cst_50 = arith.constant dense<0.000000e+00> : vector<8x384xf32>
    %191 = tpu.matmul %184, %9, %cst_50 {dimension_numbers = #tpu.dot_dimension_numbers<[1], [0], [0], [1], [0, 0, 1, 1], [], []>} : vector<8x128xf32>, vector<128x384xf32>, vector<8x384xf32> -> vector<8x384xf32>
    %192 = vector.extract_strided_slice %190 {offsets = [0, 0], sizes = [8, 128], strides = [1, 1]} : vector<8x384xf32> to vector<8x128xf32>
    %193 = vector.extract_strided_slice %191 {offsets = [0, 0], sizes = [8, 128], strides = [1, 1]} : vector<8x384xf32> to vector<8x128xf32>
    %194 = arith.addf %192, %193 : vector<8x128xf32>
    %195 = arith.negf %194 : vector<8x128xf32>
    %196 = math.exp %195 : vector<8x128xf32>
    %cst_51 = arith.constant 1.000000e+00 : f32
    %197 = vector.broadcast %cst_51 : f32 to vector<8x128xf32>
    %198 = arith.addf %197, %196 : vector<8x128xf32>
    %199 = arith.divf %197, %198 : vector<8x128xf32>
    %200 = vector.extract_strided_slice %190 {offsets = [0, 128], sizes = [8, 128], strides = [1, 1]} : vector<8x384xf32> to vector<8x128xf32>
    %201 = vector.extract_strided_slice %191 {offsets = [0, 128], sizes = [8, 128], strides = [1, 1]} : vector<8x384xf32> to vector<8x128xf32>
    %202 = arith.addf %200, %201 : vector<8x128xf32>
    %203 = arith.negf %202 : vector<8x128xf32>
    %204 = math.exp %203 : vector<8x128xf32>
    %cst_52 = arith.constant 1.000000e+00 : f32
    %205 = vector.broadcast %cst_52 : f32 to vector<8x128xf32>
    %206 = arith.addf %205, %204 : vector<8x128xf32>
    %207 = arith.divf %205, %206 : vector<8x128xf32>
    %208 = vector.extract_strided_slice %190 {offsets = [0, 256], sizes = [8, 128], strides = [1, 1]} : vector<8x384xf32> to vector<8x128xf32>
    %209 = vector.extract_strided_slice %191 {offsets = [0, 256], sizes = [8, 128], strides = [1, 1]} : vector<8x384xf32> to vector<8x128xf32>
    %210 = vector.broadcast %10 : vector<1x128xf32> to vector<8x128xf32>
    %211 = arith.addf %209, %210 : vector<8x128xf32>
    %212 = arith.mulf %199, %211 : vector<8x128xf32>
    %213 = arith.addf %208, %212 : vector<8x128xf32>
    %214 = math.tanh %213 : vector<8x128xf32>
    %cst_53 = arith.constant 1.000000e+00 : f32
    %215 = vector.broadcast %cst_53 : f32 to vector<8x128xf32>
    %216 = arith.subf %215, %207 : vector<8x128xf32>
    %217 = arith.mulf %216, %214 : vector<8x128xf32>
    %218 = arith.mulf %207, %184 : vector<8x128xf32>
    %219 = arith.addf %217, %218 : vector<8x128xf32>
    %220 = arith.index_cast %188 : i32 to index
    %c0_54 = arith.constant 0 : index
    %221 = vector.load %arg6[%220, %c0_54] : memref<64x128xf32, #tpu.memory_space<vmem>>, vector<8x128xf32>
    tpu.vector_store %arg6[%220, %c0_54], %219 {strides = array<i32>} : memref<64x128xf32, #tpu.memory_space<vmem>>, vector<8x128xf32>,
    %c6_i32 = arith.constant 6 : i32
    %c8_i32_55 = arith.constant 8 : i32
    %222 = arith.muli %c6_i32, %c8_i32_55 : i32
    %223 = tpu.assume_multiple %222, 8 : i32
    %224 = arith.index_cast %223 : i32 to index
    %c0_56 = arith.constant 0 : index
    %225 = vector.load %arg8[%224, %c0_56] : memref<64x384xf32, #tpu.memory_space<vmem>>, vector<8x384xf32>
    %cst_57 = arith.constant dense<0.000000e+00> : vector<8x384xf32>
    %226 = tpu.matmul %219, %9, %cst_57 {dimension_numbers = #tpu.dot_dimension_numbers<[1], [0], [0], [1], [0, 0, 1, 1], [], []>} : vector<8x128xf32>, vector<128x384xf32>, vector<8x384xf32> -> vector<8x384xf32>
    %227 = vector.extract_strided_slice %225 {offsets = [0, 0], sizes = [8, 128], strides = [1, 1]} : vector<8x384xf32> to vector<8x128xf32>
    %228 = vector.extract_strided_slice %226 {offsets = [0, 0], sizes = [8, 128], strides = [1, 1]} : vector<8x384xf32> to vector<8x128xf32>
    %229 = arith.addf %227, %228 : vector<8x128xf32>
    %230 = arith.negf %229 : vector<8x128xf32>
    %231 = math.exp %230 : vector<8x128xf32>
    %cst_58 = arith.constant 1.000000e+00 : f32
    %232 = vector.broadcast %cst_58 : f32 to vector<8x128xf32>
    %233 = arith.addf %232, %231 : vector<8x128xf32>
    %234 = arith.divf %232, %233 : vector<8x128xf32>
    %235 = vector.extract_strided_slice %225 {offsets = [0, 128], sizes = [8, 128], strides = [1, 1]} : vector<8x384xf32> to vector<8x128xf32>
    %236 = vector.extract_strided_slice %226 {offsets = [0, 128], sizes = [8, 128], strides = [1, 1]} : vector<8x384xf32> to vector<8x128xf32>
    %237 = arith.addf %235, %236 : vector<8x128xf32>
    %238 = arith.negf %237 : vector<8x128xf32>
    %239 = math.exp %238 : vector<8x128xf32>
    %cst_59 = arith.constant 1.000000e+00 : f32
    %240 = vector.broadcast %cst_59 : f32 to vector<8x128xf32>
    %241 = arith.addf %240, %239 : vector<8x128xf32>
    %242 = arith.divf %240, %241 : vector<8x128xf32>
    %243 = vector.extract_strided_slice %225 {offsets = [0, 256], sizes = [8, 128], strides = [1, 1]} : vector<8x384xf32> to vector<8x128xf32>
    %244 = vector.extract_strided_slice %226 {offsets = [0, 256], sizes = [8, 128], strides = [1, 1]} : vector<8x384xf32> to vector<8x128xf32>
    %245 = vector.broadcast %10 : vector<1x128xf32> to vector<8x128xf32>
    %246 = arith.addf %244, %245 : vector<8x128xf32>
    %247 = arith.mulf %234, %246 : vector<8x128xf32>
    %248 = arith.addf %243, %247 : vector<8x128xf32>
    %249 = math.tanh %248 : vector<8x128xf32>
    %cst_60 = arith.constant 1.000000e+00 : f32
    %250 = vector.broadcast %cst_60 : f32 to vector<8x128xf32>
    %251 = arith.subf %250, %242 : vector<8x128xf32>
    %252 = arith.mulf %251, %249 : vector<8x128xf32>
    %253 = arith.mulf %242, %219 : vector<8x128xf32>
    %254 = arith.addf %252, %253 : vector<8x128xf32>
    %255 = arith.index_cast %223 : i32 to index
    %c0_61 = arith.constant 0 : index
    %256 = vector.load %arg6[%255, %c0_61] : memref<64x128xf32, #tpu.memory_space<vmem>>, vector<8x128xf32>
    tpu.vector_store %arg6[%255, %c0_61], %254 {strides = array<i32>} : memref<64x128xf32, #tpu.memory_space<vmem>>, vector<8x128xf32>,
    %c7_i32 = arith.constant 7 : i32
    %c8_i32_62 = arith.constant 8 : i32
    %257 = arith.muli %c7_i32, %c8_i32_62 : i32
    %258 = tpu.assume_multiple %257, 8 : i32
    %259 = arith.index_cast %258 : i32 to index
    %c0_63 = arith.constant 0 : index
    %260 = vector.load %arg8[%259, %c0_63] : memref<64x384xf32, #tpu.memory_space<vmem>>, vector<8x384xf32>
    %cst_64 = arith.constant dense<0.000000e+00> : vector<8x384xf32>
    %261 = tpu.matmul %254, %9, %cst_64 {dimension_numbers = #tpu.dot_dimension_numbers<[1], [0], [0], [1], [0, 0, 1, 1], [], []>} : vector<8x128xf32>, vector<128x384xf32>, vector<8x384xf32> -> vector<8x384xf32>
    %262 = vector.extract_strided_slice %260 {offsets = [0, 0], sizes = [8, 128], strides = [1, 1]} : vector<8x384xf32> to vector<8x128xf32>
    %263 = vector.extract_strided_slice %261 {offsets = [0, 0], sizes = [8, 128], strides = [1, 1]} : vector<8x384xf32> to vector<8x128xf32>
    %264 = arith.addf %262, %263 : vector<8x128xf32>
    %265 = arith.negf %264 : vector<8x128xf32>
    %266 = math.exp %265 : vector<8x128xf32>
    %cst_65 = arith.constant 1.000000e+00 : f32
    %267 = vector.broadcast %cst_65 : f32 to vector<8x128xf32>
    %268 = arith.addf %267, %266 : vector<8x128xf32>
    %269 = arith.divf %267, %268 : vector<8x128xf32>
    %270 = vector.extract_strided_slice %260 {offsets = [0, 128], sizes = [8, 128], strides = [1, 1]} : vector<8x384xf32> to vector<8x128xf32>
    %271 = vector.extract_strided_slice %261 {offsets = [0, 128], sizes = [8, 128], strides = [1, 1]} : vector<8x384xf32> to vector<8x128xf32>
    %272 = arith.addf %270, %271 : vector<8x128xf32>
    %273 = arith.negf %272 : vector<8x128xf32>
    %274 = math.exp %273 : vector<8x128xf32>
    %cst_66 = arith.constant 1.000000e+00 : f32
    %275 = vector.broadcast %cst_66 : f32 to vector<8x128xf32>
    %276 = arith.addf %275, %274 : vector<8x128xf32>
    %277 = arith.divf %275, %276 : vector<8x128xf32>
    %278 = vector.extract_strided_slice %260 {offsets = [0, 256], sizes = [8, 128], strides = [1, 1]} : vector<8x384xf32> to vector<8x128xf32>
    %279 = vector.extract_strided_slice %261 {offsets = [0, 256], sizes = [8, 128], strides = [1, 1]} : vector<8x384xf32> to vector<8x128xf32>
    %280 = vector.broadcast %10 : vector<1x128xf32> to vector<8x128xf32>
    %281 = arith.addf %279, %280 : vector<8x128xf32>
    %282 = arith.mulf %269, %281 : vector<8x128xf32>
    %283 = arith.addf %278, %282 : vector<8x128xf32>
    %284 = math.tanh %283 : vector<8x128xf32>
    %cst_67 = arith.constant 1.000000e+00 : f32
    %285 = vector.broadcast %cst_67 : f32 to vector<8x128xf32>
    %286 = arith.subf %285, %277 : vector<8x128xf32>
    %287 = arith.mulf %286, %284 : vector<8x128xf32>
    %288 = arith.mulf %277, %254 : vector<8x128xf32>
    %289 = arith.addf %287, %288 : vector<8x128xf32>
    %290 = arith.index_cast %258 : i32 to index
    %c0_68 = arith.constant 0 : index
    %291 = vector.load %arg6[%290, %c0_68] : memref<64x128xf32, #tpu.memory_space<vmem>>, vector<8x128xf32>
    tpu.vector_store %arg6[%290, %c0_68], %289 {strides = array<i32>} : memref<64x128xf32, #tpu.memory_space<vmem>>, vector<8x128xf32>,
    %c8_i32_69 = arith.constant 8 : i32
    %c0_70 = arith.constant 0 : index
    %c0_71 = arith.constant 0 : index
    %292 = vector.load %arg7[%c0_70, %c0_71] : memref<8x128xf32, #tpu.memory_space<vmem>>, vector<8x128xf32>
    tpu.vector_store %arg7[%c0_70, %c0_71], %289 {strides = array<i32>} : memref<8x128xf32, #tpu.memory_space<vmem>>, vector<8x128xf32>,
    return
  }
}

</mosaic_0001>

<bundles_post_ra>
// kernel: tpu_custom_call.1
= control target key start
LH: loop header
LB: loop body
LE: loop exit
PB: predicated region body
PF: predicated region fallthrough
CT: control target
= control target key end

     0   :  { %13 = vsyncpa [#allocation4], 0  ;;  %s3572_s0 = inlined_call_operand.vmem [shape: f32[64,32], index: 0, kind: input, shape index: {}]   ;;  %s3573_s1 = inlined_call_operand.hbm [shape: f32[8,128], index: 1, kind: input, shape index: {}]   ;;  %s3574_s2 = inlined_call_operand.vmem [shape: f32[32,384], index: 2, kind: input, shape index: {}]   ;;  %s3575_s3 = inlined_call_operand.hbm [shape: f32[128,384], index: 3, kind: input, shape index: {}]   ;;  %s3576_s4 = inlined_call_operand.vmem [shape: f32[1,384], index: 4, kind: input, shape index: {}]   ;;  %s3577_s5 = inlined_call_operand.vmem [shape: f32[1,128], index: 5, kind: input, shape index: {}]   ;;  %s3578_s6 = inlined_call_operand.hbm [shape: f32[64,128], index: 6, kind: output, shape index: {0}]   ;;  %s3579_s7 = inlined_call_operand.hbm [shape: f32[8,128], index: 7, kind: output, shape index: {1}]  }
   0x1   :  { %14 = vsyncpa [#allocation7], 0 }
   0x2   :  { %15 = vsyncpa [#allocation5], 0 }
   0x3   :  { %16 = vsyncpa [#allocation10], 0  ;;  %s2536_s24 = smov [#allocation3]   ;;  %s2537_s26 = smov [#allocation6]  }
   0x4   :  { %s25_s25 = sshll.u32 %s2536_s24, 4  ;;  %s36_s27 = sshll.u32 %s2537_s26, 4  ;;  %s26_s25 = int_to_ptr.vmem [resolvable:$true] %s25_s25  ;;  %s37_s27 = int_to_ptr.vmem [resolvable:$true] %s36_s27 }
   0x5   :  { %s2456_s28 = scalar_lea.vmem %s26_s25, 128  ;;  %p2461_p1 = scmp.lt.s32.totalorder %s26_s25, %s26_s25 }
   0x6   :  { %p2457_p0 = scmp.ne.s32.totalorder %s26_s25, %s2456_s28  ;;  %p2462_p2 = scmp.lt.s32.totalorder %s2456_s28, %s2456_s28 }
   0x8   :  { %p2463_p3 = por %p2462_p2, %p2461_p1 }
   0xa   :  { %p2464_p4 = pnand %p2463_p3, %p2457_p0 }
   0xc   :  { %2467 = shalt.err (!%p2464_p4)
}
   0xd   :  { %28 = dma.hbm_to_vmem [thread:$0]  %s3573_s1, 128, %s26_s25, [#allocation4]  }
   0xe   :  { %s2476_s8 = scalar_lea.vmem %s37_s27, 6144  ;;  %p2481_p6 = scmp.lt.s32.totalorder %s37_s27, %s37_s27 }
   0xf   :  { %p2477_p5 = scmp.ne.s32.totalorder %s37_s27, %s2476_s8  ;;  %p2482_p7 = scmp.lt.s32.totalorder %s2476_s8, %s2476_s8 }
  0x11   :  { %p2483_p8 = por %p2482_p7, %p2481_p6 }
  0x13   :  { %p2484_p9 = pnand %p2483_p8, %p2477_p5 }
  0x15   :  { %2487 = shalt.err (!%p2484_p9)
}
  0x16   :  { %s2538_s9 = smov 384   ;;  %s2539_s10 = smov 24  }
  0x17   :  { %42 = dma.hbm_to_vmem [thread:$0]  %s3575_s3, 6144, %s37_s27, [#allocation7], %s2538_s9, %s2538_s9, %s2539_s10  }
  0x18   :  { %2528 = dma.done.wait [#allocation4], 128  }
  0x19   :  { %2529 = vsyncadd [#allocation4], 4294967168 }
  0x1a   :  { %2530 = dma.done.wait [#allocation7], 6144  }
  0x1b   :  { %2531 = vsyncadd [#allocation7], 4294961152  ;;  %v3580_v0 = vmov 0.0   ;;  %v79_v1 = vld [vmem:[%s3574_s2 + $0x50] sm:$0xff]  ;;  %v78_v2 = vld [vmem:[%s3574_s2 + $0x48] sm:$0xff]  ;;  %vm98_vm0 = vcmask 261120  }
  0x1c   :  { %187 = vmatprep.mubr.f32.mxu0 %v3580_v0  ;;  %v76_v3 = vld [vmem:[%s3574_s2 + $0x38] sm:$0xff]  ;;  %147 = vmatprep.subr.mxu0 %v79_v1  ;;  %v75_v4 = vld [vmem:[%s3574_s2 + $0x30] sm:$0xff]  ;;  %v73_v5 = vld [vmem:[%s3574_s2 + $0x20] sm:$0xff]  ;;  %vm2541_vm1 = vmmov 0   ;;  %s2543_s30 = smov [#allocation9]  }
  0x1d   :  { %148 = vmatpush1.msra.mxu0 %v78_v2  ;;  %v53_v6 = vld [vmem:[%s3572_s0] sm:$0xff]  ;;  %v72_v7 = vld [vmem:[%s3574_s2 + $0x18] sm:$0xff]  ;;  %v70_v9 = vld [vmem:[%s3574_s2 + $0x8] sm:$0xff]  ;;  %s1807_s8 = sshll.u32 %s2543_s30, 4  ;;  %s1808_s8 = int_to_ptr.vmem [resolvable:$true] %s1807_s8 }
  0x1e   :  { %149 = vmatprep.subr.mxu0 %v76_v3  ;;  %v61_v8 = vmax.f32 %v53_v6, 0.0  ;;  %v69_v10 = vld [vmem:[%s3574_s2] sm:$0xff]  ;;  %v2621_v11 = vld [vmem:[#allocation6 + $0x170] sm:$0xff]  ;;  %v2626_v12 = vld [vmem:[%s3572_s0 + $0x8] sm:$0xff] }
  0x1f   :  { %150 = vmatpush1.msra.mxu0 %v75_v4  ;;  %3600 = vst [vmem:[#allocation15_spill] sm:$0xff] %v2621_v11  ;;  %v2628_v13 = vld [vmem:[#allocation6 + $0x168] sm:$0xff]  ;;  %v2630_v14 = vld [vmem:[#allocation6 + $0x158] sm:$0xff]  ;;  %v2634_v15 = vld [vmem:[#allocation6 + $0x150] sm:$0xff]  ;;  %v62_v16 = vmax.f32 %v2626_v12, 0.0 }
  0x20   :  { %151 = vmatprep.subr.mxu0 %v73_v5  ;;  %2017 = vmatprep.mubr.msk.f32.mxu1 %vm98_vm0, %v61_v8  ;;  %v2639_v17 = vld [vmem:[#allocation6 + $0x140] sm:$0xff]  ;;  %v2644_v18 = vld [vmem:[%s3572_s0 + $0x10] sm:$0xff]  ;;  %v2647_v19 = vld [vmem:[#allocation6 + $0x138] sm:$0xff] }
  0x21   :  { %152 = vmatpush1.msra.mxu0 %v72_v7  ;;  %v2650_v20 = vld [vmem:[#allocation6 + $0x128] sm:$0xff]  ;;  %v80_v21 = vld [vmem:[%s3574_s2 + $0x58] sm:$0xff]  ;;  %v2659_v22 = vld [vmem:[#allocation6 + $0x120] sm:$0xff]  ;;  %v63_v23 = vmax.f32 %v2644_v18, 0.0 }
  0x22   :  { %153 = vmatprep.subr.mxu0 %v70_v9  ;;  %v2664_v24 = vld [vmem:[#allocation6 + $0x110] sm:$0xff]  ;;  %v2672_v26 = vld [vmem:[#allocation6 + $0x108] sm:$0xff]  ;;  %2009 = vmatprep.subr.mxu1 %v80_v21  ;;  %v2675_v27 = vld [vmem:[#allocation6 + $0xf8] sm:$0xff] }
  0x23   :  { %154 = vmatpush1.msra.mxu0 %v69_v10  ;;  %v2669_v25 = vld [vmem:[%s3572_s0 + $0x18] sm:$0xff]  ;;  %2010 = vmatpush3.msra.mxu1 %v80_v21  ;;  %v77_v28 = vld [vmem:[%s3574_s2 + $0x40] sm:$0xff]  ;;  %v2689_v31 = vld [vmem:[#allocation6 + $0xe0] sm:$0xff] }
  0x24   :  { %1828 = vmatmul.mubr.msk.f32.vlgmr.msra.gmra.mxu0 %vm98_vm0, %v61_v8  ;;  %421 = vmatprep.subr.mxu0 %v2621_v11  ;;  %v2684_v29 = vld [vmem:[#allocation6 + $0xf0] sm:$0xff]  ;;  %v64_v30 = vmax.f32 %v2669_v25, 0.0  ;;  %v2694_v32 = vld [vmem:[%s3572_s0 + $0x20] sm:$0xff]  ;;  %v2700_v34 = vld [vmem:[#allocation6 + $0xc8] sm:$0xff] }
  0x25   :  { %422 = vmatpush1.msra.mxu0 %v2628_v13  ;;  %193 = vmatprep.mubr.f32.mxu0 %v3580_v0  ;;  %v2697_v33 = vld [vmem:[#allocation6 + $0xd8] sm:$0xff]  ;;  %v74_v35 = vld [vmem:[%s3574_s2 + $0x28] sm:$0xff]  ;;  %v65_v37 = vmax.f32 %v2694_v32, 0.0  ;;  %v2714_v38 = vld [vmem:[#allocation6 + $0xb0] sm:$0xff] }
  0x26   :  { %423 = vmatprep.subr.mxu0 %v2630_v14  ;;  %2011 = vmatprep.subr.mxu1 %v77_v28  ;;  %v2709_v36 = vld [vmem:[#allocation6 + $0xc0] sm:$0xff]  ;;  %v2722_v40 = vld [vmem:[#allocation6 + $0xa8] sm:$0xff]  ;;  %v2725_v41 = vld [vmem:[#allocation6 + $0x98] sm:$0xff] }
  0x27   :  { %424 = vmatpush1.msra.mxu0 %v2634_v15  ;;  %2012 = vmatpush3.msra.mxu1 %v77_v28  ;;  %v2719_v39 = vld [vmem:[%s3572_s0 + $0x28] sm:$0xff]  ;;  %v71_v42 = vld [vmem:[%s3574_s2 + $0x10] sm:$0xff]  ;;  %v2734_v43 = vld [vmem:[#allocation6 + $0x90] sm:$0xff] }
  0x28   :  { %1829 = vmatmul.mubr.msk.f32.gmra.mxu0 %vm98_vm0, %v62_v16  ;;  %425 = vmatprep.subr.mxu0 %v2639_v17  ;;  %v66_v44 = vmax.f32 %v2719_v39, 0.0  ;;  %v2739_v45 = vld [vmem:[#allocation6 + $0x80] sm:$0xff]  ;;  %v2744_v46 = vld [vmem:[%s3572_s0 + $0x30] sm:$0xff]  ;;  %v2747_v47 = vld [vmem:[#allocation6 + $0x78] sm:$0xff] }
  0x29   :  { %426 = vmatpush1.msra.mxu0 %v2647_v19  ;;  %199 = vmatprep.mubr.f32.mxu0 %v3580_v0  ;;  %v2750_v48 = vld [vmem:[#allocation6 + $0x68] sm:$0xff]  ;;  %v2756_v49 = vld [vmem:[#allocation6 + $0x60] sm:$0xff]  ;;  %v67_v50 = vmax.f32 %v2744_v46, 0.0  ;;  %v2761_v51 = vld [vmem:[#allocation6 + $0x50] sm:$0xff] }
  0x2a   :  { %427 = vmatprep.subr.mxu0 %v2650_v20  ;;  %2013 = vmatprep.subr.mxu1 %v74_v35  ;;  %v2766_v52 = vld [vmem:[%s3572_s0 + $0x38] sm:$0xff]  ;;  %v2769_v53 = vld [vmem:[#allocation6 + $0x48] sm:$0xff]  ;;  %v2773_v54 = vld [vmem:[#allocation6 + $0x38] sm:$0xff] }
  0x2b   :  { %428 = vmatpush1.msra.mxu0 %v2659_v22  ;;  %2014 = vmatpush3.msra.mxu1 %v74_v35  ;;  %v2778_v55 = vld [vmem:[#allocation6 + $0x178] sm:$0xff]  ;;  %v2782_v56 = vld [vmem:[#allocation6 + $0x30] sm:$0xff]  ;;  %v68_v57 = vmax.f32 %v2766_v52, 0.0  ;;  %v2787_v58 = vld [vmem:[#allocation6 + $0x20] sm:$0xff] }
  0x2c   :  { %1830 = vmatmul.mubr.msk.f32.gmra.mxu0 %vm98_vm0, %v63_v23  ;;  %429 = vmatprep.subr.mxu0 %v2664_v24  ;;  %3601 = vst [vmem:[#allocation16_spill] sm:$0xff] %v2787_v58  ;;  %v2790_v59 = vld [vmem:[#allocation6 + $0x18] sm:$0xff]  ;;  %v2794_v60 = vld [vmem:[#allocation6 + $0x8] sm:$0xff]  ;;  %v2797_v61 = vld [vmem:[#allocation6 + $0x160] sm:$0xff] }
  0x2d   :  { %430 = vmatpush1.msra.mxu0 %v2672_v26  ;;  %205 = vmatprep.mubr.f32.mxu0 %v3580_v0  ;;  %3602 = vst [vmem:[#allocation17_spill] sm:$0xff] %v2790_v59  ;;  %3603 = vst [vmem:[#allocation18_spill] sm:$0xff] %v2794_v60  ;;  %v2801_v62 = vld [vmem:[#allocation6] sm:$0xff]  ;;  %v2805_v63 = vld [vmem:[#allocation3] sm:$0xff] }
  0x2e   :  { %431 = vmatprep.subr.mxu0 %v2675_v27  ;;  %2015 = vmatprep.subr.mxu1 %v71_v42  ;;  %3604 = vst [vmem:[#allocation19_spill] sm:$0xff] %v2801_v62  ;;  %v2807_v1 = vld [vmem:[#allocation6 + $0x148] sm:$0xff]  ;;  %v2813_v2 = vld [vmem:[#allocation6 + $0x130] sm:$0xff]  ;;  %v2818_v3 = vld [vmem:[#allocation6 + $0x118] sm:$0xff] }
  0x2f   :  { %432 = vmatpush1.msra.mxu0 %v2684_v29  ;;  %2016 = vmatpush3.msra.mxu1 %v71_v42  ;;  %v2826_v4 = vld [vmem:[#allocation6 + $0x100] sm:$0xff]  ;;  %v2836_v5 = vld [vmem:[#allocation6 + $0xe8] sm:$0xff]  ;;  %v2842_v6 = vld [vmem:[#allocation6 + $0xd0] sm:$0xff] }
  0x30   :  { %1831 = vmatmul.mubr.msk.f32.gmra.mxu0 %vm98_vm0, %v64_v30  ;;  %433 = vmatprep.subr.mxu0 %v2689_v31  ;;  %v2850_v7 = vld [vmem:[#allocation6 + $0xb8] sm:$0xff]  ;;  %v2856_v8 = vld [vmem:[#allocation6 + $0xa0] sm:$0xff]  ;;  %v2863_v9 = vld [vmem:[#allocation6 + $0x88] sm:$0xff] }
  0x31   :  { %434 = vmatpush1.msra.mxu0 %v2697_v33  ;;  %211 = vmatprep.mubr.f32.mxu0 %v3580_v0  ;;  %v2869_v10 = vld [vmem:[#allocation6 + $0x70] sm:$0xff]  ;;  %v2875_v12 = vld [vmem:[#allocation6 + $0x58] sm:$0xff]  ;;  %v2887_v18 = vld [vmem:[#allocation6 + $0x28] sm:$0xff] }
  0x32   :  { %435 = vmatprep.subr.mxu0 %v2700_v34  ;;  %2029 = vmatprep.subr.mxu1 %v3580_v0  ;;  %3605 = vst [vmem:[#allocation20_spill] sm:$0xff] %v2887_v18  ;;  %v2893_v21 = vld [vmem:[#allocation6 + $0x10] sm:$0xff] }
  0x33   :  { %436 = vmatpush1.msra.mxu0 %v2709_v36  ;;  %2018 = vmatmul.mubr.msk.f32.vlgmr.msra.gmra.mxu1 %vm98_vm0, %v62_v16  ;;  %v2881_v16 = vld [vmem:[#allocation6 + $0x40] sm:$0xff]  ;;  %3606 = vst [vmem:[#allocation21_spill] sm:$0xff] %v2893_v21 }
  0x34   :  { %1832 = vmatmul.mubr.msk.f32.gmra.mxu0 %vm98_vm0, %v65_v37  ;;  %437 = vmatprep.subr.mxu0 %v2714_v38 }
  0x35   :  { %438 = vmatpush1.msra.mxu0 %v2722_v40  ;;  %217 = vmatprep.mubr.f32.mxu0 %v3580_v0 }
  0x36   :  { %439 = vmatprep.subr.mxu0 %v2725_v41  ;;  %2030 = vmatpush3.msra.mxu1 %v2778_v55 }
  0x37   :  { %440 = vmatpush1.msra.mxu0 %v2734_v43  ;;  %2031 = vmatprep.subr.mxu1 %v3580_v0 }
  0x38   :  { %1833 = vmatmul.mubr.msk.f32.gmra.mxu0 %vm98_vm0, %v66_v44  ;;  %441 = vmatprep.subr.mxu0 %v2739_v45 }
  0x39   :  { %442 = vmatpush1.msra.mxu0 %v2747_v47  ;;  %223 = vmatprep.mubr.f32.mxu0 %v3580_v0 }
  0x3a   :  { %443 = vmatprep.subr.mxu0 %v2750_v48  ;;  %2032 = vmatpush3.msra.mxu1 %v2797_v61 }
  0x3b   :  { %444 = vmatpush1.msra.mxu0 %v2756_v49  ;;  %2033 = vmatprep.subr.mxu1 %v3580_v0 }
  0x3c   :  { %1834 = vmatmul.mubr.msk.f32.gmra.mxu0 %vm98_vm0, %v67_v50  ;;  %445 = vmatprep.subr.mxu0 %v2761_v51 }
  0x3d   :  { %446 = vmatpush1.msra.mxu0 %v2769_v53  ;;  %229 = vmatprep.mubr.f32.mxu0 %v3580_v0 }
  0x3e   :  { %447 = vmatprep.subr.mxu0 %v2773_v54  ;;  %2034 = vmatpush3.msra.mxu1 %v2807_v1 }
  0x3f   :  { %448 = vmatpush1.msra.mxu0 %v2782_v56  ;;  %2035 = vmatprep.subr.mxu1 %v3580_v0 }
  0x40   :  { %1835 = vmatmul.mubr.msk.f32.gmra.mxu0 %vm98_vm0, %v68_v57  ;;  %449 = vmatprep.subr.mxu0 %v2787_v58 }
  0x41   :  { %450 = vmatpush1.msra.mxu0 %v2790_v59  ;;  %485 = vmatprep.mubr.f32.mxu0 %v3580_v0 }
  0x42   :  { %451 = vmatprep.subr.mxu0 %v2794_v60  ;;  %2020 = vmatprep.mubr.msk.f32.mxu1 %vm98_vm0, %v63_v23  ;;  %v83_v23 = vlaneseq }
  0x43   :  { %452 = vmatpush1.msra.mxu0 %v2801_v62  ;;  %2036 = vmatpush3.msra.mxu1 %v2813_v2 }
  0x44   :  { %486 = vmatmul.mubr.f32.vlgmr.msra.gmra.mxu0 %v2805_v63  ;;  %597 = vmatprep.subr.mxu0 %v2621_v11  ;;  %v84_v25 = vshrl.u32 %v83_v23, 7 }
  0x45   :  { %2037 = vmatprep.subr.mxu1 %v3580_v0  ;;  %2021 = vmatmul.mubr.msk.f32.gmra.mxu1 %vm98_vm0, %v64_v30  ;;  %v81_v30 = vld [vmem:[%s3576_s4] sm:$0x7] }
  0x46   :  { %2038 = vmatpush3.msra.mxu1 %v2818_v3  ;;  %2023 = vmatprep.mubr.msk.f32.mxu1 %vm98_vm0, %v65_v37  ;;  %v85_v28 = vsub.s32 0, %v84_v25  ;;  %v89_v35 = vsub.s32 1, %v84_v25 }
  0x47   :  { %2039 = vmatprep.subr.mxu1 %v3580_v0  ;;  %598 = vmatpush1.msra.mxu0 %v2628_v13 }
  0x48   :  { %2040 = vmatpush3.msra.mxu1 %v2826_v4  ;;  %599 = vmatprep.subr.mxu0 %v2630_v14  ;;  %v86_v39 = vrot.slane %v81_v30, %v85_v28 }
  0x49   :  { %2041 = vmatprep.subr.mxu1 %v3580_v0  ;;  %2024 = vmatmul.mubr.msk.f32.gmra.mxu1 %vm98_vm0, %v66_v44  ;;  %v90_v44 = vrot.slane %v81_v30, %v89_v35 }
  0x4a   :  { %2042 = vmatpush3.msra.mxu1 %v2836_v5  ;;  %2026 = vmatprep.mubr.msk.f32.mxu1 %vm98_vm0, %v67_v50 }
  0x4b   :  { %2043 = vmatprep.subr.mxu1 %v3580_v0  ;;  %600 = vmatpush1.msra.mxu0 %v2634_v15 }
  0x4c   :  { %2044 = vmatpush3.msra.mxu1 %v2842_v6  ;;  %601 = vmatprep.subr.mxu0 %v2639_v17 }
  0x4d   :  { %2045 = vmatprep.subr.mxu1 %v3580_v0  ;;  %2027 = vmatmul.mubr.msk.f32.gmra.mxu1 %vm98_vm0, %v68_v57 }
  0x4e   :  { %2046 = vmatpush3.msra.mxu1 %v2850_v7  ;;  %2061 = vmatprep.mubr.msk.f32.mxu1 %vm2541_vm1, %v3580_v0 }
  0x4f   :  { %2047 = vmatprep.subr.mxu1 %v3580_v0  ;;  %602 = vmatpush1.msra.mxu0 %v2647_v19 }
  0x50   :  { %2048 = vmatpush3.msra.mxu1 %v2856_v8  ;;  %603 = vmatprep.subr.mxu0 %v2650_v20 }
  0x51   :  { %2049 = vmatprep.subr.mxu1 %v3580_v0  ;;  %604 = vmatpush1.msra.mxu0 %v2659_v22 }
  0x52   :  { %2050 = vmatpush3.msra.mxu1 %v2863_v9  ;;  %605 = vmatprep.subr.mxu0 %v2664_v24 }
  0x53   :  { %2051 = vmatprep.subr.mxu1 %v3580_v0  ;;  %606 = vmatpush1.msra.mxu0 %v2672_v26 }
  0x54   :  { %2052 = vmatpush3.msra.mxu1 %v2869_v10  ;;  %607 = vmatprep.subr.mxu0 %v2675_v27 }
  0x55   :  { %2053 = vmatprep.subr.mxu1 %v3580_v0  ;;  %608 = vmatpush1.msra.mxu0 %v2684_v29 }
  0x56   :  { %2054 = vmatpush3.msra.mxu1 %v2875_v12  ;;  %609 = vmatprep.subr.mxu0 %v2689_v31 }
  0x57   :  { %2055 = vmatprep.subr.mxu1 %v3580_v0  ;;  %610 = vmatpush1.msra.mxu0 %v2697_v33 }
  0x58   :  { %2056 = vmatpush3.msra.mxu1 %v2881_v16  ;;  %611 = vmatprep.subr.mxu0 %v2700_v34 }
  0x59   :  { %2057 = vmatprep.subr.mxu1 %v3580_v0  ;;  %612 = vmatpush1.msra.mxu0 %v2709_v36 }
  0x5a   :  { %2058 = vmatpush3.msra.mxu1 %v2887_v18  ;;  %613 = vmatprep.subr.mxu0 %v2714_v38 }
  0x5b   :  { %2059 = vmatprep.subr.mxu1 %v3580_v0  ;;  %614 = vmatpush1.msra.mxu0 %v2722_v40 }
  0x5c   :  { %2060 = vmatpush3.msra.mxu1 %v2893_v21  ;;  %615 = vmatprep.subr.mxu0 %v2725_v41 }
  0x5d   :  { %2062 = vmatmul.mubr.f32.vlgmr.msra.gmra.mxu1 %v2805_v63  ;;  %2064 = vmatprep.subr.mxu1 %v3580_v0 }
  0x5e   :  { %2065 = vmatpush3.msra.mxu1 %v2778_v55  ;;  %616 = vmatpush1.msra.mxu0 %v2734_v43 }
  0x5f   :  { %2066 = vmatprep.subr.mxu1 %v3580_v0  ;;  %617 = vmatprep.subr.mxu0 %v2739_v45 }
  0x60   :  { %2067 = vmatpush3.msra.mxu1 %v2797_v61  ;;  %618 = vmatpush1.msra.mxu0 %v2747_v47 }
  0x61   :  { %2068 = vmatprep.subr.mxu1 %v3580_v0  ;;  %619 = vmatprep.subr.mxu0 %v2750_v48 }
  0x62   :  { %2069 = vmatpush3.msra.mxu1 %v2807_v1  ;;  %620 = vmatpush1.msra.mxu0 %v2756_v49 }
  0x63   :  { %2070 = vmatprep.subr.mxu1 %v3580_v0  ;;  %621 = vmatprep.subr.mxu0 %v2761_v51 }
  0x64   :  { %2071 = vmatpush3.msra.mxu1 %v2813_v2  ;;  %622 = vmatpush1.msra.mxu0 %v2769_v53 }
  0x65   :  { %2072 = vmatprep.subr.mxu1 %v3580_v0  ;;  %623 = vmatprep.subr.mxu0 %v2773_v54 }
  0x66   :  { %2073 = vmatpush3.msra.mxu1 %v2818_v3  ;;  %624 = vmatpush1.msra.mxu0 %v2782_v56 }
  0x67   :  { %2074 = vmatprep.subr.mxu1 %v3580_v0  ;;  %625 = vmatprep.subr.mxu0 %v2787_v58 }
  0x68   :  { %2075 = vmatpush3.msra.mxu1 %v2826_v4  ;;  %626 = vmatpush1.msra.mxu0 %v2790_v59  ;;  %v93_v59 = vsub.s32 2, %v84_v25 }
  0x69   :  { %2076 = vmatprep.subr.mxu1 %v3580_v0  ;;  %627 = vmatprep.subr.mxu0 %v2794_v60 }
  0x6a   :  { %2077 = vmatpush3.msra.mxu1 %v2836_v5  ;;  %628 = vmatpush1.msra.mxu0 %v2801_v62 }
  0x6b   :  { %2078 = vmatprep.subr.mxu1 %v3580_v0  ;;  %661 = vmatprep.mubr.f32.mxu0 %v3580_v0 }
  0x6c   :  { %2079 = vmatpush3.msra.mxu1 %v2842_v6  ;;  %2096 = vmatprep.mubr.msk.f32.mxu1 %vm2541_vm1, %v3580_v0 }
  0x6d   :  { %2080 = vmatprep.subr.mxu1 %v3580_v0  ;;  %768 = vmatprep.subr.mxu0 %v2621_v11 }
  0x6e   :  { %2081 = vmatpush3.msra.mxu1 %v2850_v7 }
  0x6f   :  { %2082 = vmatprep.subr.mxu1 %v3580_v0 }
  0x70   :  { %2083 = vmatpush3.msra.mxu1 %v2856_v8 }
  0x71   :  { %2084 = vmatprep.subr.mxu1 %v3580_v0 }
  0x72   :  { %2085 = vmatpush3.msra.mxu1 %v2863_v9 }
  0x73   :  { %2086 = vmatprep.subr.mxu1 %v3580_v0 }
  0x74   :  { %2087 = vmatpush3.msra.mxu1 %v2869_v10 }
  0x75   :  { %2088 = vmatprep.subr.mxu1 %v3580_v0 }
  0x76   :  { %2089 = vmatpush3.msra.mxu1 %v2875_v12 }
  0x77   :  { %2090 = vmatprep.subr.mxu1 %v3580_v0 }
  0x78   :  { %2091 = vmatpush3.msra.mxu1 %v2881_v16 }
  0x79   :  { %2092 = vmatprep.subr.mxu1 %v3580_v0 }
  0x7a   :  { %2093 = vmatpush3.msra.mxu1 %v2887_v18 }
  0x7b   :  { %2094 = vmatprep.subr.mxu1 %v3580_v0 }
  0x7c   :  { %2095 = vmatpush3.msra.mxu1 %v2893_v21 }
  0x7d   :  { %2099 = vmatprep.subr.mxu1 %v3580_v0 }
  0xe4   :  { %v189_v32 = vpop.f32.mrf.mxu0 }
  0xe6   :  { %v191_v37 = vpop.f32.mrf.mxu0 }
  0xe8   :  { %v195_v42 = vpop.f32.mrf.mxu0 }
  0xe9   :  { %v2956_v46 = vadd.f32 %v195_v42, %v86_v39 }
  0xea   :  { %v197_v50 = vpop.f32.mrf.mxu0 }
  0xeb   :  { %3607 = vst [vmem:[#allocation22_spill] sm:$0xff] %v2956_v46  ;;  %v2958_v52 = vadd.f32 %v197_v50, %v90_v44 }
  0xec   :  { %v201_v57 = vpop.f32.mrf.mxu0 }
  0xed   :  { %3608 = vst [vmem:[#allocation23_spill] sm:$0xff] %v2958_v52  ;;  %v2960_v0 = vadd.f32 %v201_v57, %v86_v39  ;;  %v94_v52 = vrot.slane %v81_v30, %v93_v59 }
  0xee   :  { %v203_v23 = vpop.f32.mrf.mxu0 }
  0xef   :  { %3609 = vst [vmem:[#allocation24_spill] sm:$0xff] %v2960_v0  ;;  %v2962_v11 = vadd.f32 %v203_v23, %v90_v44 }
  0xf0   :  { %v207_v21 = vpop.f32.mrf.mxu0 }
  0xf1   :  { %3610 = vst [vmem:[#allocation25_spill] sm:$0xff] %v2962_v11  ;;  %v2964_v62 = vadd.f32 %v207_v21, %v86_v39 }
  0xf2   :  { %v209_v60 = vpop.f32.mrf.mxu0 }
  0xf3   :  { %3611 = vst [vmem:[#allocation26_spill] sm:$0xff] %v2964_v62  ;;  %v2966_v18 = vadd.f32 %v209_v60, %v90_v44  ;;  %v2019_v11 = vpop.f32.mrf.mxu1 }
  0xf4   :  { %v213_v28 = vpop.f32.mrf.mxu0  ;;  %v2976_v62 = vadd.f32 %v2019_v11, %v94_v52 }
  0xf5   :  { %3612 = vst [vmem:[#allocation27_spill] sm:$0xff] %v2966_v18  ;;  %v2968_v35 = vadd.f32 %v213_v28, %v86_v39 }
  0xf6   :  { %v215_v42 = vpop.f32.mrf.mxu0 }
  0xf7   :  { %3613 = vst [vmem:[#allocation28_spill] sm:$0xff] %v2968_v35  ;;  %v2970_v46 = vadd.f32 %v215_v42, %v90_v44 }
  0xf8   :  { %v219_v50 = vpop.f32.mrf.mxu0 }
  0xf9   :  { %3614 = vst [vmem:[#allocation29_spill] sm:$0xff] %v2970_v46  ;;  %v2972_v57 = vadd.f32 %v219_v50, %v86_v39  ;;  %v190_v46 = vadd.f32 %v189_v32, %v86_v39 }
  0xfa   :  { %v221_v0 = vpop.f32.mrf.mxu0 }
  0xfb   :  { %3615 = vst [vmem:[#allocation30_spill] sm:$0xff] %v2972_v57  ;;  %v2974_v23 = vadd.f32 %v221_v0, %v90_v44  ;;  %v302_v0 = vpop.f32.mrf.mxu1 }
  0xfc   :  { %v225_v21 = vpop.f32.mrf.mxu0 }
  0xfd   :  { %3616 = vst [vmem:[#allocation31_spill] sm:$0xff] %v2974_v23  ;;  %v2978_v60 = vadd.f32 %v225_v21, %v86_v39  ;;  %v192_v21 = vadd.f32 %v191_v37, %v90_v44 }
  0xfe   :  { %v227_v18 = vpop.f32.mrf.mxu0 }
  0xff   :  { %3617 = vst [vmem:[#allocation32_spill] sm:$0xff] %v2978_v60  ;;  %v2980_v25 = vadd.f32 %v227_v18, %v90_v44 }
 0x100   :  { %v231_v28 = vpop.f32.mrf.mxu0 }
 0x101   :  { %3618 = vst [vmem:[#allocation33_spill] sm:$0xff] %v2980_v25  ;;  %v2982_v35 = vadd.f32 %v231_v28, %v86_v39 }
 0x102   :  { %v233_v42 = vpop.f32.mrf.mxu0 }
 0x103   :  { %3619 = vst [vmem:[#allocation34_spill] sm:$0xff] %v2982_v35  ;;  %v2984_v59 = vadd.f32 %v233_v42, %v90_v44 }
 0x104   :  { %v487_v30 = vpop.f32.mrf.mxu0 }
 0x105   :  { %3620 = vst [vmem:[#allocation35_spill] sm:$0xff] %v2984_v59  ;;  %v562_v50 = vadd.f32 %v487_v30, %v190_v46  ;;  %v2022_v57 = vpop.f32.mrf.mxu1 }
 0x106   :  { %v489_v58 = vpop.f32.mrf.mxu0  ;;  %v2986_v11 = vadd.f32 %v2022_v57, %v94_v52 }
 0x107   :  { %v1844_v23 = vmul.f32 -1.442695, %v562_v50  ;;  %v312_v60 = vpop.f32.mrf.mxu1  ;;  %v569_v25 = vadd.f32 %v489_v58, %v192_v21  ;;  %v3001_v58 = vld [vmem:[%s3577_s5] ss:$0 sm:$0xff] }
 0x108   :  { %3621 = vst [vmem:[#allocation36_spill] sm:$0xff] %v2986_v11  ;;  %v2988_v18 = vadd.f32 %v312_v60, %v94_v52 }
 0x109   :  { %2319 = vpow2.f32 %v1844_v23  ;;  %v2025_v28 = vpop.f32.mrf.mxu1  ;;  %v1845_v42 = vmul.f32 -1.442695, %v569_v25 }
 0x10a   :  { %3622 = vst [vmem:[#allocation37_spill] sm:$0xff] %v2988_v18  ;;  %v2990_v35 = vadd.f32 %v2025_v28, %v94_v52 }
 0x10b   :  { %v322_v32 = vpop.f32.mrf.mxu1  ;;  %2321 = vpow2.f32 %v1845_v42 }
 0x10c   :  { %3623 = vst [vmem:[#allocation38_spill] sm:$0xff] %v2990_v35  ;;  %v2992_v39 = vadd.f32 %v322_v32, %v94_v52  ;;  %v303_v32 = vadd.f32 %v302_v0, %v94_v52  ;;  %v3630_v0 = vld [vmem:[#allocation20_spill] sm:$0xff] }
 0x10d   :  { %v2028_v46 = vpop.f32.mrf.mxu1 }
 0x10e   :  { %3624 = vst [vmem:[#allocation39_spill] sm:$0xff] %v2992_v39  ;;  %v2994_v30 = vadd.f32 %v2028_v46, %v94_v52 }
 0x10f   :  { %v332_v50 = vpop.f32.mrf.mxu1 }
 0x110   :  { %3625 = vst [vmem:[#allocation40_spill] sm:$0xff] %v2994_v30  ;;  %v2996_v59 = vadd.f32 %v332_v50, %v94_v52  ;;  %v3627_v52 = vmov 0.0  }
 0x112   :  { %3626 = vst [vmem:[#allocation41_spill] sm:$0xff] %v2996_v59 }
 0x116   :  { %v2320_v37 = vpop.eup %2319 }
 0x117   :  { %v566_v44 = vadd.f32 1.0, %v2320_v37 }
 0x118   :  { %v2322_v23 = vpop.eup %2321 }
 0x119   :  { %2323 = vrcp.f32 %v566_v44  ;;  %v573_v21 = vadd.f32 1.0, %v2322_v23  ;;  %v3633_v23 = vld [vmem:[#allocation21_spill] sm:$0xff] }
 0x11b   :  { %2325 = vrcp.f32 %v573_v21 }
 0x11d   :  { %v558_v57 = vpop.f32.mrf.mxu1 }
 0x11e   :  { %v582_v25 = vadd.f32 %v3001_v58, %v558_v57  ;;  %v3632_v57 = vld [vmem:[#allocation19_spill] sm:$0xff] }
 0x11f   :  { %v2063_v60 = vpop.f32.mrf.mxu1 }
 0x120   :  { %v3634_v60 = vld [vmem:[#allocation15_spill] sm:$0xff] }
 0x126   :  { %v2324_v28 = vpop.eup %2323 }
 0x127   :  { %v583_v46 = vmul.f32 %v2324_v28, %v582_v25  ;;  %v3635_v28 = vld [vmem:[#allocation22_spill] sm:$0xff] }
 0x128   :  { %v2326_v42 = vpop.eup %2325 }
 0x129   :  { %v584_v50 = vadd.f32 %v583_v46, %v303_v32  ;;  %v586_v37 = vsub.f32 1.0, %v2326_v42  ;;  %v588_v59 = vmul.f32 %v2326_v42, %v2805_v63  ;;  %v3628_v63 = vld [vmem:[#allocation16_spill] sm:$0xff] }
 0x12b   :  { %2327 = vtanh.f32 %v584_v50 }
 0x138   :  { %v2328_v44 = vpop.eup %2327 }
 0x139   :  { %v587_v30 = vmul.f32 %v2328_v44, %v586_v37  ;;  %v3636_v37 = vld [vmem:[#allocation23_spill] sm:$0xff] }
 0x13b   :  { %v3005_v35 = vadd.f32 %v588_v59, %v587_v30  ;;  %v3629_v59 = vld [vmem:[#allocation17_spill] sm:$0xff]  ;;  %v3631_v30 = vld [vmem:[#allocation18_spill] sm:$0xff] }
 0x13d   :  { %590 = vst [vmem:[#allocation8] sm:$0xff] %v3005_v35  ;;  %662 = vmatmul.mubr.f32.vlgmr.msra.gmra.mxu0 %v3005_v35  ;;  %2097 = vmatmul.mubr.f32.vlgmr.msra.gmra.mxu1 %v3005_v35 }
 0x13e   :  { %769 = vmatpush1.msra.mxu0 %v2628_v13  ;;  %2100 = vmatpush3.msra.mxu1 %v2778_v55 }
 0x13f   :  { %770 = vmatprep.subr.mxu0 %v2630_v14  ;;  %2101 = vmatprep.subr.mxu1 %v3627_v52 }
 0x140   :  { %771 = vmatpush1.msra.mxu0 %v2634_v15  ;;  %2102 = vmatpush3.msra.mxu1 %v2797_v61 }
 0x141   :  { %772 = vmatprep.subr.mxu0 %v2639_v17  ;;  %2103 = vmatprep.subr.mxu1 %v3627_v52 }
 0x142   :  { %773 = vmatpush1.msra.mxu0 %v2647_v19  ;;  %2104 = vmatpush3.msra.mxu1 %v2807_v1 }
 0x143   :  { %774 = vmatprep.subr.mxu0 %v2650_v20  ;;  %2105 = vmatprep.subr.mxu1 %v3627_v52 }
 0x144   :  { %775 = vmatpush1.msra.mxu0 %v2659_v22  ;;  %2106 = vmatpush3.msra.mxu1 %v2813_v2 }
 0x145   :  { %776 = vmatprep.subr.mxu0 %v2664_v24  ;;  %2107 = vmatprep.subr.mxu1 %v3627_v52 }
 0x146   :  { %777 = vmatpush1.msra.mxu0 %v2672_v26  ;;  %2108 = vmatpush3.msra.mxu1 %v2818_v3 }
 0x147   :  { %778 = vmatprep.subr.mxu0 %v2675_v27  ;;  %2109 = vmatprep.subr.mxu1 %v3627_v52 }
 0x148   :  { %779 = vmatpush1.msra.mxu0 %v2684_v29  ;;  %2110 = vmatpush3.msra.mxu1 %v2826_v4 }
 0x149   :  { %780 = vmatprep.subr.mxu0 %v2689_v31  ;;  %2111 = vmatprep.subr.mxu1 %v3627_v52 }
 0x14a   :  { %781 = vmatpush1.msra.mxu0 %v2697_v33  ;;  %2112 = vmatpush3.msra.mxu1 %v2836_v5 }
 0x14b   :  { %782 = vmatprep.subr.mxu0 %v2700_v34  ;;  %2113 = vmatprep.subr.mxu1 %v3627_v52 }
 0x14c   :  { %783 = vmatpush1.msra.mxu0 %v2709_v36  ;;  %2114 = vmatpush3.msra.mxu1 %v2842_v6 }
 0x14d   :  { %784 = vmatprep.subr.mxu0 %v2714_v38  ;;  %2115 = vmatprep.subr.mxu1 %v3627_v52 }
 0x14e   :  { %785 = vmatpush1.msra.mxu0 %v2722_v40  ;;  %2116 = vmatpush3.msra.mxu1 %v2850_v7 }
 0x14f   :  { %786 = vmatprep.subr.mxu0 %v2725_v41  ;;  %2117 = vmatprep.subr.mxu1 %v3627_v52 }
 0x150   :  { %787 = vmatpush1.msra.mxu0 %v2734_v43  ;;  %2118 = vmatpush3.msra.mxu1 %v2856_v8 }
 0x151   :  { %788 = vmatprep.subr.mxu0 %v2739_v45  ;;  %2119 = vmatprep.subr.mxu1 %v3627_v52 }
 0x152   :  { %789 = vmatpush1.msra.mxu0 %v2747_v47  ;;  %2120 = vmatpush3.msra.mxu1 %v2863_v9 }
 0x153   :  { %790 = vmatprep.subr.mxu0 %v2750_v48  ;;  %2121 = vmatprep.subr.mxu1 %v3627_v52 }
 0x154   :  { %791 = vmatpush1.msra.mxu0 %v2756_v49  ;;  %2122 = vmatpush3.msra.mxu1 %v2869_v10 }
 0x155   :  { %792 = vmatprep.subr.mxu0 %v2761_v51  ;;  %2123 = vmatprep.subr.mxu1 %v3627_v52 }
 0x156   :  { %793 = vmatpush1.msra.mxu0 %v2769_v53  ;;  %2124 = vmatpush3.msra.mxu1 %v2875_v12 }
 0x157   :  { %794 = vmatprep.subr.mxu0 %v2773_v54  ;;  %2125 = vmatprep.subr.mxu1 %v3627_v52 }
 0x158   :  { %795 = vmatpush1.msra.mxu0 %v2782_v56  ;;  %2126 = vmatpush3.msra.mxu1 %v2881_v16 }
 0x159   :  { %796 = vmatprep.subr.mxu0 %v3628_v63  ;;  %2127 = vmatprep.subr.mxu1 %v3627_v52 }
 0x15a   :  { %797 = vmatpush1.msra.mxu0 %v3629_v59  ;;  %2128 = vmatpush3.msra.mxu1 %v3630_v0 }
 0x15b   :  { %798 = vmatprep.subr.mxu0 %v3631_v30  ;;  %2129 = vmatprep.subr.mxu1 %v3627_v52 }
 0x15c   :  { %799 = vmatpush1.msra.mxu0 %v3632_v57  ;;  %832 = vmatprep.mubr.f32.mxu0 %v3627_v52 }
 0x15d   :  { %2130 = vmatpush3.msra.mxu1 %v3633_v23  ;;  %2131 = vmatprep.mubr.msk.f32.mxu1 %vm2541_vm1, %v3627_v52 }
 0x15e   :  { %939 = vmatprep.subr.mxu0 %v3634_v60  ;;  %2134 = vmatprep.subr.mxu1 %v3627_v52 }
 0x1fd   :  { %v663_v21 = vpop.f32.mrf.mxu0  ;;  %v734_v25 = vpop.f32.mrf.mxu1 }
 0x1fe   :  { %v738_v32 = vadd.f32 %v663_v21, %v3635_v28  ;;  %v752_v60 = vadd.f32 %v3001_v58, %v734_v25  ;;  %v3643_v25 = vld [vmem:[#allocation25_spill] sm:$0xff] }
 0x1ff   :  { %v2098_v46 = vpop.f32.mrf.mxu1  ;;  %v665_v42 = vpop.f32.mrf.mxu0 }
 0x200   :  { %v1847_v50 = vmul.f32 -1.442695, %v738_v32  ;;  %v745_v44 = vadd.f32 %v665_v42, %v3636_v37 }
 0x202   :  { %2329 = vpow2.f32 %v1847_v50  ;;  %v1848_v39 = vmul.f32 -1.442695, %v745_v44 }
 0x204   :  { %2331 = vpow2.f32 %v1848_v39 }
 0x20f   :  { %v2330_v11 = vpop.eup %2329 }
 0x210   :  { %v742_v18 = vadd.f32 1.0, %v2330_v11 }
 0x211   :  { %v2332_v23 = vpop.eup %2331 }
 0x212   :  { %2333 = vrcp.f32 %v742_v18  ;;  %v749_v57 = vadd.f32 1.0, %v2332_v23 }
 0x214   :  { %2335 = vrcp.f32 %v749_v57 }
 0x21f   :  { %v2334_v30 = vpop.eup %2333 }
 0x220   :  { %v753_v0 = vmul.f32 %v2334_v30, %v752_v60 }
 0x221   :  { %v2336_v28 = vpop.eup %2335 }
 0x222   :  { %v754_v21 = vadd.f32 %v753_v0, %v2976_v62  ;;  %v756_v32 = vsub.f32 1.0, %v2336_v28  ;;  %v758_v42 = vmul.f32 %v2336_v28, %v3005_v35  ;;  %v3640_v62 = vld [vmem:[#allocation21_spill] sm:$0xff]  ;;  %v3641_v35 = vld [vmem:[#allocation15_spill] sm:$0xff]  ;;  %v3642_v0 = vld [vmem:[#allocation24_spill] sm:$0xff] }
 0x224   :  { %2337 = vtanh.f32 %v754_v21 }
 0x231   :  { %v2338_v46 = vpop.eup %2337 }
 0x232   :  { %v757_v50 = vmul.f32 %v2338_v46, %v756_v32 }
 0x234   :  { %v3082_v39 = vadd.f32 %v758_v42, %v757_v50 }
 0x236   :  { %761 = vst [vmem:[#allocation8 + $0x8] sm:$0xff] %v3082_v39  ;;  %833 = vmatmul.mubr.f32.vlgmr.msra.gmra.mxu0 %v3082_v39  ;;  %2132 = vmatmul.mubr.f32.vlgmr.msra.gmra.mxu1 %v3082_v39 }
 0x237   :  { %940 = vmatpush1.msra.mxu0 %v2628_v13  ;;  %2135 = vmatpush3.msra.mxu1 %v2778_v55  ;;  %v3637_v13 = vld [vmem:[#allocation20_spill] sm:$0xff] }
 0x238   :  { %941 = vmatprep.subr.mxu0 %v2630_v14  ;;  %2136 = vmatprep.subr.mxu1 %v3627_v52  ;;  %v3638_v14 = vld [vmem:[#allocation18_spill] sm:$0xff] }
 0x239   :  { %942 = vmatpush1.msra.mxu0 %v2634_v15  ;;  %2137 = vmatpush3.msra.mxu1 %v2797_v61  ;;  %v3639_v15 = vld [vmem:[#allocation19_spill] sm:$0xff] }
 0x23a   :  { %943 = vmatprep.subr.mxu0 %v2639_v17  ;;  %2138 = vmatprep.subr.mxu1 %v3627_v52 }
 0x23b   :  { %944 = vmatpush1.msra.mxu0 %v2647_v19  ;;  %2139 = vmatpush3.msra.mxu1 %v2807_v1 }
 0x23c   :  { %945 = vmatprep.subr.mxu0 %v2650_v20  ;;  %2140 = vmatprep.subr.mxu1 %v3627_v52 }
 0x23d   :  { %946 = vmatpush1.msra.mxu0 %v2659_v22  ;;  %2141 = vmatpush3.msra.mxu1 %v2813_v2 }
 0x23e   :  { %947 = vmatprep.subr.mxu0 %v2664_v24  ;;  %2142 = vmatprep.subr.mxu1 %v3627_v52 }
 0x23f   :  { %948 = vmatpush1.msra.mxu0 %v2672_v26  ;;  %2143 = vmatpush3.msra.mxu1 %v2818_v3 }
 0x240   :  { %949 = vmatprep.subr.mxu0 %v2675_v27  ;;  %2144 = vmatprep.subr.mxu1 %v3627_v52 }
 0x241   :  { %950 = vmatpush1.msra.mxu0 %v2684_v29  ;;  %2145 = vmatpush3.msra.mxu1 %v2826_v4 }
 0x242   :  { %951 = vmatprep.subr.mxu0 %v2689_v31  ;;  %2146 = vmatprep.subr.mxu1 %v3627_v52 }
 0x243   :  { %952 = vmatpush1.msra.mxu0 %v2697_v33  ;;  %2147 = vmatpush3.msra.mxu1 %v2836_v5 }
 0x244   :  { %953 = vmatprep.subr.mxu0 %v2700_v34  ;;  %2148 = vmatprep.subr.mxu1 %v3627_v52 }
 0x245   :  { %954 = vmatpush1.msra.mxu0 %v2709_v36  ;;  %2149 = vmatpush3.msra.mxu1 %v2842_v6 }
 0x246   :  { %955 = vmatprep.subr.mxu0 %v2714_v38  ;;  %2150 = vmatprep.subr.mxu1 %v3627_v52 }
 0x247   :  { %956 = vmatpush1.msra.mxu0 %v2722_v40  ;;  %2151 = vmatpush3.msra.mxu1 %v2850_v7 }
 0x248   :  { %957 = vmatprep.subr.mxu0 %v2725_v41  ;;  %2152 = vmatprep.subr.mxu1 %v3627_v52 }
 0x249   :  { %958 = vmatpush1.msra.mxu0 %v2734_v43  ;;  %2153 = vmatpush3.msra.mxu1 %v2856_v8 }
 0x24a   :  { %959 = vmatprep.subr.mxu0 %v2739_v45  ;;  %2154 = vmatprep.subr.mxu1 %v3627_v52 }
 0x24b   :  { %960 = vmatpush1.msra.mxu0 %v2747_v47  ;;  %2155 = vmatpush3.msra.mxu1 %v2863_v9 }
 0x24c   :  { %961 = vmatprep.subr.mxu0 %v2750_v48  ;;  %2156 = vmatprep.subr.mxu1 %v3627_v52 }
 0x24d   :  { %962 = vmatpush1.msra.mxu0 %v2756_v49  ;;  %2157 = vmatpush3.msra.mxu1 %v2869_v10 }
 0x24e   :  { %963 = vmatprep.subr.mxu0 %v2761_v51  ;;  %2158 = vmatprep.subr.mxu1 %v3627_v52 }
 0x24f   :  { %964 = vmatpush1.msra.mxu0 %v2769_v53  ;;  %2159 = vmatpush3.msra.mxu1 %v2875_v12 }
 0x250   :  { %965 = vmatprep.subr.mxu0 %v2773_v54  ;;  %2160 = vmatprep.subr.mxu1 %v3627_v52 }
 0x251   :  { %966 = vmatpush1.msra.mxu0 %v2782_v56  ;;  %2161 = vmatpush3.msra.mxu1 %v2881_v16 }
 0x252   :  { %967 = vmatprep.subr.mxu0 %v3628_v63  ;;  %2162 = vmatprep.subr.mxu1 %v3627_v52 }
 0x253   :  { %968 = vmatpush1.msra.mxu0 %v3629_v59  ;;  %2163 = vmatpush3.msra.mxu1 %v3637_v13 }
 0x254   :  { %969 = vmatprep.subr.mxu0 %v3638_v14  ;;  %2164 = vmatprep.subr.mxu1 %v3627_v52 }
 0x255   :  { %970 = vmatpush1.msra.mxu0 %v3639_v15  ;;  %1003 = vmatprep.mubr.f32.mxu0 %v3627_v52 }
 0x256   :  { %2165 = vmatpush3.msra.mxu1 %v3640_v62  ;;  %2166 = vmatprep.mubr.msk.f32.mxu1 %vm2541_vm1, %v3627_v52  ;;  %v3644_v62 = vld [vmem:[#allocation37_spill] sm:$0xff] }
 0x257   :  { %1110 = vmatprep.subr.mxu0 %v3641_v35  ;;  %2169 = vmatprep.subr.mxu1 %v3627_v52 }
 0x2f6   :  { %v834_v11 = vpop.f32.mrf.mxu0  ;;  %v905_v18 = vpop.f32.mrf.mxu1 }
 0x2f7   :  { %v909_v30 = vadd.f32 %v834_v11, %v3642_v0  ;;  %v923_v50 = vadd.f32 %v3001_v58, %v905_v18  ;;  %v3164_v18 = vld [vmem:[#allocation6 + $0x168] sm:$0xff] }
 0x2f8   :  { %v2133_v57 = vpop.f32.mrf.mxu1  ;;  %v836_v60 = vpop.f32.mrf.mxu0 }
 0x2f9   :  { %v1849_v23 = vmul.f32 -1.442695, %v909_v30  ;;  %v916_v37 = vadd.f32 %v836_v60, %v3643_v25 }
 0x2fb   :  { %2339 = vpow2.f32 %v1849_v23  ;;  %v1850_v44 = vmul.f32 -1.442695, %v916_v37  ;;  %v3261_v37 = vld [vmem:[#allocation6 + $0x138] sm:$0xff] }
 0x2fd   :  { %2341 = vpow2.f32 %v1850_v44  ;;  %v3265_v44 = vld [vmem:[#allocation6 + $0x128] sm:$0xff] }
 0x308   :  { %v2340_v21 = vpop.eup %2339 }
 0x309   :  { %v913_v28 = vadd.f32 1.0, %v2340_v21  ;;  %v3269_v21 = vld [vmem:[#allocation6 + $0x120] sm:$0xff] }
 0x30a   :  { %v2342_v32 = vpop.eup %2341 }
 0x30b   :  { %2343 = vrcp.f32 %v913_v28  ;;  %v920_v46 = vadd.f32 1.0, %v2342_v32  ;;  %v3277_v28 = vld [vmem:[#allocation6 + $0x108] sm:$0xff]  ;;  %v3285_v32 = vld [vmem:[#allocation6 + $0xf0] sm:$0xff] }
 0x30d   :  { %2345 = vrcp.f32 %v920_v46  ;;  %v3293_v46 = vld [vmem:[#allocation6 + $0xd8] sm:$0xff] }
 0x318   :  { %v2344_v42 = vpop.eup %2343 }
 0x319   :  { %v924_v35 = vmul.f32 %v2344_v42, %v923_v50  ;;  %v3301_v50 = vld [vmem:[#allocation6 + $0xc0] sm:$0xff]  ;;  %v3309_v42 = vld [vmem:[#allocation6 + $0xa8] sm:$0xff] }
 0x31a   :  { %v2346_v0 = vpop.eup %2345 }
 0x31b   :  { %v925_v11 = vadd.f32 %v924_v35, %v3644_v62  ;;  %v927_v30 = vsub.f32 1.0, %v2346_v0  ;;  %v929_v60 = vmul.f32 %v2346_v0, %v3082_v39  ;;  %v3168_v62 = vld [vmem:[#allocation6 + $0x158] sm:$0xff]  ;;  %v3172_v39 = vld [vmem:[#allocation6 + $0x150] sm:$0xff]  ;;  %v3333_v0 = vld [vmem:[#allocation6 + $0x60] sm:$0xff] }
 0x31c   :  { %v3317_v35 = vld [vmem:[#allocation6 + $0x90] sm:$0xff] }
 0x31d   :  { %2347 = vtanh.f32 %v925_v11  ;;  %v3325_v11 = vld [vmem:[#allocation6 + $0x78] sm:$0xff] }
 0x32a   :  { %v2348_v57 = vpop.eup %2347 }
 0x32b   :  { %v928_v23 = vmul.f32 %v2348_v57, %v927_v30  ;;  %v3341_v30 = vld [vmem:[#allocation6 + $0x48] sm:$0xff]  ;;  %v3349_v57 = vld [vmem:[#allocation6 + $0x30] sm:$0xff] }
 0x32d   :  { %v3159_v25 = vadd.f32 %v929_v60, %v928_v23  ;;  %v3357_v23 = vld [vmem:[#allocation6 + $0x18] sm:$0xff]  ;;  %v3365_v60 = vld [vmem:[#allocation6] sm:$0xff] }
 0x32e   :  { %3650 = vst [vmem:[#allocation17_spill] sm:$0xff] %v3365_v60 }
 0x32f   :  { %932 = vst [vmem:[#allocation8 + $0x10] sm:$0xff] %v3159_v25  ;;  %1004 = vmatmul.mubr.f32.vlgmr.msra.gmra.mxu0 %v3159_v25  ;;  %2167 = vmatmul.mubr.f32.vlgmr.msra.gmra.mxu1 %v3159_v25 }
 0x330   :  { %1111 = vmatpush1.msra.mxu0 %v3164_v18  ;;  %2170 = vmatpush3.msra.mxu1 %v2778_v55 }
 0x331   :  { %1112 = vmatprep.subr.mxu0 %v3168_v62  ;;  %2171 = vmatprep.subr.mxu1 %v3627_v52 }
 0x332   :  { %1113 = vmatpush1.msra.mxu0 %v3172_v39  ;;  %2172 = vmatpush3.msra.mxu1 %v2797_v61 }
 0x333   :  { %1114 = vmatprep.subr.mxu0 %v2639_v17  ;;  %2173 = vmatprep.subr.mxu1 %v3627_v52  ;;  %v3645_v17 = vld [vmem:[#allocation21_spill] sm:$0xff] }
 0x334   :  { %1115 = vmatpush1.msra.mxu0 %v2647_v19  ;;  %2174 = vmatpush3.msra.mxu1 %v2807_v1  ;;  %v3235_v19 = vld [vmem:[#allocation6 + $0x170] sm:$0xff] }
 0x335   :  { %1116 = vmatprep.subr.mxu0 %v2650_v20  ;;  %2175 = vmatprep.subr.mxu1 %v3627_v52 }
 0x336   :  { %1117 = vmatpush1.msra.mxu0 %v2659_v22  ;;  %2176 = vmatpush3.msra.mxu1 %v2813_v2 }
 0x337   :  { %1118 = vmatprep.subr.mxu0 %v2664_v24  ;;  %2177 = vmatprep.subr.mxu1 %v3627_v52  ;;  %v3646_v24 = vld [vmem:[#allocation26_spill] sm:$0xff] }
 0x338   :  { %1119 = vmatpush1.msra.mxu0 %v2672_v26  ;;  %2178 = vmatpush3.msra.mxu1 %v2818_v3 }
 0x339   :  { %1120 = vmatprep.subr.mxu0 %v2675_v27  ;;  %2179 = vmatprep.subr.mxu1 %v3627_v52 }
 0x33a   :  { %1121 = vmatpush1.msra.mxu0 %v2684_v29  ;;  %2180 = vmatpush3.msra.mxu1 %v2826_v4 }
 0x33b   :  { %1122 = vmatprep.subr.mxu0 %v2689_v31  ;;  %2181 = vmatprep.subr.mxu1 %v3627_v52 }
 0x33c   :  { %1123 = vmatpush1.msra.mxu0 %v2697_v33  ;;  %2182 = vmatpush3.msra.mxu1 %v2836_v5  ;;  %v3647_v33 = vld [vmem:[#allocation27_spill] sm:$0xff] }
 0x33d   :  { %1124 = vmatprep.subr.mxu0 %v2700_v34  ;;  %2183 = vmatprep.subr.mxu1 %v3627_v52 }
 0x33e   :  { %1125 = vmatpush1.msra.mxu0 %v2709_v36  ;;  %2184 = vmatpush3.msra.mxu1 %v2842_v6 }
 0x33f   :  { %1126 = vmatprep.subr.mxu0 %v2714_v38  ;;  %2185 = vmatprep.subr.mxu1 %v3627_v52 }
 0x340   :  { %1127 = vmatpush1.msra.mxu0 %v2722_v40  ;;  %2186 = vmatpush3.msra.mxu1 %v2850_v7 }
 0x341   :  { %1128 = vmatprep.subr.mxu0 %v2725_v41  ;;  %2187 = vmatprep.subr.mxu1 %v3627_v52 }
 0x342   :  { %1129 = vmatpush1.msra.mxu0 %v2734_v43  ;;  %2188 = vmatpush3.msra.mxu1 %v2856_v8 }
 0x343   :  { %1130 = vmatprep.subr.mxu0 %v2739_v45  ;;  %2189 = vmatprep.subr.mxu1 %v3627_v52 }
 0x344   :  { %1131 = vmatpush1.msra.mxu0 %v2747_v47  ;;  %2190 = vmatpush3.msra.mxu1 %v2863_v9 }
 0x345   :  { %1132 = vmatprep.subr.mxu0 %v2750_v48  ;;  %2191 = vmatprep.subr.mxu1 %v3627_v52 }
 0x346   :  { %1133 = vmatpush1.msra.mxu0 %v2756_v49  ;;  %2192 = vmatpush3.msra.mxu1 %v2869_v10  ;;  %v3648_v49 = vld [vmem:[#allocation36_spill] sm:$0xff] }
 0x347   :  { %1134 = vmatprep.subr.mxu0 %v2761_v51  ;;  %2193 = vmatprep.subr.mxu1 %v3627_v52 }
 0x348   :  { %1135 = vmatpush1.msra.mxu0 %v2769_v53  ;;  %2194 = vmatpush3.msra.mxu1 %v2875_v12 }
 0x349   :  { %1136 = vmatprep.subr.mxu0 %v2773_v54  ;;  %2195 = vmatprep.subr.mxu1 %v3627_v52 }
 0x34a   :  { %1137 = vmatpush1.msra.mxu0 %v2782_v56  ;;  %2196 = vmatpush3.msra.mxu1 %v2881_v16 }
 0x34b   :  { %1138 = vmatprep.subr.mxu0 %v3628_v63  ;;  %2197 = vmatprep.subr.mxu1 %v3627_v52 }
 0x34c   :  { %1139 = vmatpush1.msra.mxu0 %v3629_v59  ;;  %2198 = vmatpush3.msra.mxu1 %v3637_v13 }
 0x34d   :  { %1140 = vmatprep.subr.mxu0 %v3638_v14  ;;  %2199 = vmatprep.subr.mxu1 %v3627_v52  ;;  %v3250_v14 = vld [vmem:[#allocation6 + $0x178] sm:$0xff] }
 0x34e   :  { %1141 = vmatpush1.msra.mxu0 %v3639_v15  ;;  %1174 = vmatprep.mubr.f32.mxu0 %v3627_v52  ;;  %v3257_v15 = vld [vmem:[#allocation6 + $0x140] sm:$0xff] }
 0x34f   :  { %2200 = vmatpush3.msra.mxu1 %v3645_v17  ;;  %2201 = vmatprep.mubr.msk.f32.mxu1 %vm2541_vm1, %v3627_v52 }
 0x350   :  { %1281 = vmatprep.subr.mxu0 %v3235_v19  ;;  %2204 = vmatprep.subr.mxu1 %v3627_v52 }
 0x3ef   :  { %v1005_v20 = vpop.f32.mrf.mxu0  ;;  %v1076_v22 = vpop.f32.mrf.mxu1 }
 0x3f0   :  { %v1080_v26 = vadd.f32 %v1005_v20, %v3646_v24  ;;  %v1094_v45 = vadd.f32 %v3001_v58, %v1076_v22 }
 0x3f1   :  { %v2168_v27 = vpop.f32.mrf.mxu1  ;;  %v1007_v31 = vpop.f32.mrf.mxu0 }
 0x3f2   :  { %v1851_v29 = vmul.f32 -1.442695, %v1080_v26  ;;  %v1087_v34 = vadd.f32 %v1007_v31, %v3647_v33  ;;  %v3652_v27 = vld [vmem:[#allocation29_spill] sm:$0xff] }
 0x3f4   :  { %2349 = vpow2.f32 %v1851_v29  ;;  %v1852_v36 = vmul.f32 -1.442695, %v1087_v34 }
 0x3f6   :  { %2351 = vpow2.f32 %v1852_v36 }
 0x401   :  { %v2350_v38 = vpop.eup %2349 }
 0x402   :  { %v1084_v40 = vadd.f32 1.0, %v2350_v38 }
 0x403   :  { %v2352_v41 = vpop.eup %2351 }
 0x404   :  { %2353 = vrcp.f32 %v1084_v40  ;;  %v1091_v43 = vadd.f32 1.0, %v2352_v41 }
 0x406   :  { %2355 = vrcp.f32 %v1091_v43  ;;  %v3653_v43 = vld [vmem:[#allocation39_spill] sm:$0xff] }
 0x411   :  { %v2354_v47 = vpop.eup %2353 }
 0x412   :  { %v1095_v48 = vmul.f32 %v2354_v47, %v1094_v45 }
 0x413   :  { %v2356_v53 = vpop.eup %2355 }
 0x414   :  { %v1096_v51 = vadd.f32 %v1095_v48, %v3648_v49  ;;  %v1098_v54 = vsub.f32 1.0, %v2356_v53  ;;  %v1100_v63 = vmul.f32 %v2356_v53, %v3159_v25  ;;  %v3651_v25 = vld [vmem:[#allocation28_spill] sm:$0xff] }
 0x416   :  { %2357 = vtanh.f32 %v1096_v51 }
 0x423   :  { %v2358_v55 = vpop.eup %2357 }
 0x424   :  { %v1099_v56 = vmul.f32 %v2358_v55, %v1098_v54  ;;  %v3389_v55 = vld [vmem:[#allocation6 + $0x160] sm:$0xff] }
 0x426   :  { %v3244_v59 = vadd.f32 %v1100_v63, %v1099_v56  ;;  %v3395_v56 = vld [vmem:[#allocation6 + $0x148] sm:$0xff]  ;;  %v3401_v63 = vld [vmem:[#allocation6 + $0x130] sm:$0xff] }
 0x428   :  { %1103 = vst [vmem:[#allocation8 + $0x18] sm:$0xff] %v3244_v59  ;;  %1175 = vmatmul.mubr.f32.vlgmr.msra.gmra.mxu0 %v3244_v59  ;;  %2202 = vmatmul.mubr.f32.vlgmr.msra.gmra.mxu1 %v3244_v59 }
 0x429   :  { %1282 = vmatpush1.msra.mxu0 %v3164_v18  ;;  %2205 = vmatpush3.msra.mxu1 %v3250_v14 }
 0x42a   :  { %1283 = vmatprep.subr.mxu0 %v3168_v62  ;;  %2206 = vmatprep.subr.mxu1 %v3627_v52 }
 0x42b   :  { %1284 = vmatpush1.msra.mxu0 %v3172_v39  ;;  %2207 = vmatpush3.msra.mxu1 %v2797_v61  ;;  %v3273_v61 = vld [vmem:[#allocation6 + $0x110] sm:$0xff] }
 0x42c   :  { %1285 = vmatprep.subr.mxu0 %v3257_v15  ;;  %2208 = vmatprep.subr.mxu1 %v3627_v52 }
 0x42d   :  { %1286 = vmatpush1.msra.mxu0 %v3261_v37  ;;  %2209 = vmatpush3.msra.mxu1 %v2807_v1  ;;  %v3281_v1 = vld [vmem:[#allocation6 + $0xf8] sm:$0xff] }
 0x42e   :  { %1287 = vmatprep.subr.mxu0 %v3265_v44  ;;  %2210 = vmatprep.subr.mxu1 %v3627_v52 }
 0x42f   :  { %1288 = vmatpush1.msra.mxu0 %v3269_v21  ;;  %2211 = vmatpush3.msra.mxu1 %v2813_v2  ;;  %v3289_v2 = vld [vmem:[#allocation6 + $0xe0] sm:$0xff] }
 0x430   :  { %1289 = vmatprep.subr.mxu0 %v3273_v61  ;;  %2212 = vmatprep.subr.mxu1 %v3627_v52 }
 0x431   :  { %1290 = vmatpush1.msra.mxu0 %v3277_v28  ;;  %2213 = vmatpush3.msra.mxu1 %v2818_v3  ;;  %v3297_v3 = vld [vmem:[#allocation6 + $0xc8] sm:$0xff] }
 0x432   :  { %1291 = vmatprep.subr.mxu0 %v3281_v1  ;;  %2214 = vmatprep.subr.mxu1 %v3627_v52 }
 0x433   :  { %1292 = vmatpush1.msra.mxu0 %v3285_v32  ;;  %2215 = vmatpush3.msra.mxu1 %v2826_v4  ;;  %v3305_v4 = vld [vmem:[#allocation6 + $0xb0] sm:$0xff] }
 0x434   :  { %1293 = vmatprep.subr.mxu0 %v3289_v2  ;;  %2216 = vmatprep.subr.mxu1 %v3627_v52 }
 0x435   :  { %1294 = vmatpush1.msra.mxu0 %v3293_v46  ;;  %2217 = vmatpush3.msra.mxu1 %v2836_v5  ;;  %v3313_v5 = vld [vmem:[#allocation6 + $0x98] sm:$0xff] }
 0x436   :  { %1295 = vmatprep.subr.mxu0 %v3297_v3  ;;  %2218 = vmatprep.subr.mxu1 %v3627_v52 }
 0x437   :  { %1296 = vmatpush1.msra.mxu0 %v3301_v50  ;;  %2219 = vmatpush3.msra.mxu1 %v2842_v6  ;;  %v3321_v6 = vld [vmem:[#allocation6 + $0x80] sm:$0xff] }
 0x438   :  { %1297 = vmatprep.subr.mxu0 %v3305_v4  ;;  %2220 = vmatprep.subr.mxu1 %v3627_v52 }
 0x439   :  { %1298 = vmatpush1.msra.mxu0 %v3309_v42  ;;  %2221 = vmatpush3.msra.mxu1 %v2850_v7  ;;  %v3329_v7 = vld [vmem:[#allocation6 + $0x68] sm:$0xff] }
 0x43a   :  { %1299 = vmatprep.subr.mxu0 %v3313_v5  ;;  %2222 = vmatprep.subr.mxu1 %v3627_v52 }
 0x43b   :  { %1300 = vmatpush1.msra.mxu0 %v3317_v35  ;;  %2223 = vmatpush3.msra.mxu1 %v2856_v8  ;;  %v3337_v8 = vld [vmem:[#allocation6 + $0x50] sm:$0xff] }
 0x43c   :  { %1301 = vmatprep.subr.mxu0 %v3321_v6  ;;  %2224 = vmatprep.subr.mxu1 %v3627_v52 }
 0x43d   :  { %1302 = vmatpush1.msra.mxu0 %v3325_v11  ;;  %2225 = vmatpush3.msra.mxu1 %v2863_v9  ;;  %v3345_v9 = vld [vmem:[#allocation6 + $0x38] sm:$0xff] }
 0x43e   :  { %1303 = vmatprep.subr.mxu0 %v3329_v7  ;;  %2226 = vmatprep.subr.mxu1 %v3627_v52 }
 0x43f   :  { %1304 = vmatpush1.msra.mxu0 %v3333_v0  ;;  %2227 = vmatpush3.msra.mxu1 %v2869_v10  ;;  %v3353_v10 = vld [vmem:[#allocation6 + $0x20] sm:$0xff] }
 0x440   :  { %1305 = vmatprep.subr.mxu0 %v3337_v8  ;;  %2228 = vmatprep.subr.mxu1 %v3627_v52 }
 0x441   :  { %1306 = vmatpush1.msra.mxu0 %v3341_v30  ;;  %2229 = vmatpush3.msra.mxu1 %v2875_v12  ;;  %v3361_v12 = vld [vmem:[#allocation6 + $0x8] sm:$0xff] }
 0x442   :  { %1307 = vmatprep.subr.mxu0 %v3345_v9  ;;  %2230 = vmatprep.subr.mxu1 %v3627_v52  ;;  %3649 = vst [vmem:[#allocation16_spill] sm:$0xff] %v3361_v12 }
 0x443   :  { %1308 = vmatpush1.msra.mxu0 %v3349_v57  ;;  %2231 = vmatpush3.msra.mxu1 %v2881_v16 }
 0x444   :  { %1309 = vmatprep.subr.mxu0 %v3353_v10  ;;  %2232 = vmatprep.subr.mxu1 %v3627_v52 }
 0x445   :  { %1310 = vmatpush1.msra.mxu0 %v3357_v23  ;;  %2233 = vmatpush3.msra.mxu1 %v3637_v13 }
 0x446   :  { %1311 = vmatprep.subr.mxu0 %v3361_v12  ;;  %2234 = vmatprep.subr.mxu1 %v3627_v52 }
 0x447   :  { %1312 = vmatpush1.msra.mxu0 %v3365_v60  ;;  %1345 = vmatprep.mubr.f32.mxu0 %v3627_v52 }
 0x448   :  { %2235 = vmatpush3.msra.mxu1 %v3645_v17  ;;  %2236 = vmatprep.mubr.msk.f32.mxu1 %vm2541_vm1, %v3627_v52 }
 0x449   :  { %1452 = vmatprep.subr.mxu0 %v3235_v19  ;;  %2239 = vmatprep.subr.mxu1 %v3627_v52 }
 0x4e8   :  { %v1176_v16 = vpop.f32.mrf.mxu0  ;;  %v1247_v13 = vpop.f32.mrf.mxu1 }
 0x4e9   :  { %v1251_v20 = vadd.f32 %v1176_v16, %v3651_v25  ;;  %v1265_v38 = vadd.f32 %v3001_v58, %v1247_v13  ;;  %v3413_v16 = vld [vmem:[#allocation6 + $0x100] sm:$0xff]  ;;  %v3419_v13 = vld [vmem:[#allocation6 + $0xe8] sm:$0xff]  ;;  %v3425_v25 = vld [vmem:[#allocation6 + $0xd0] sm:$0xff] }
 0x4ea   :  { %v2203_v22 = vpop.f32.mrf.mxu1  ;;  %v1178_v26 = vpop.f32.mrf.mxu0 }
 0x4eb   :  { %v1853_v24 = vmul.f32 -1.442695, %v1251_v20  ;;  %v1258_v29 = vadd.f32 %v1178_v26, %v3652_v27  ;;  %v3431_v20 = vld [vmem:[#allocation6 + $0xb8] sm:$0xff]  ;;  %v3437_v22 = vld [vmem:[#allocation6 + $0xa0] sm:$0xff]  ;;  %v3449_v26 = vld [vmem:[#allocation6 + $0x70] sm:$0xff] }
 0x4ec   :  { %v3455_v27 = vld [vmem:[#allocation6 + $0x58] sm:$0xff] }
 0x4ed   :  { %2359 = vpow2.f32 %v1853_v24  ;;  %v1854_v31 = vmul.f32 -1.442695, %v1258_v29  ;;  %v3443_v24 = vld [vmem:[#allocation6 + $0x88] sm:$0xff]  ;;  %v3461_v29 = vld [vmem:[#allocation6 + $0x40] sm:$0xff] }
 0x4ef   :  { %2361 = vpow2.f32 %v1854_v31  ;;  %v3467_v31 = vld [vmem:[#allocation6 + $0x28] sm:$0xff] }
 0x4f0   :  { %3654 = vst [vmem:[#allocation22_spill] sm:$0xff] %v3467_v31 }
 0x4fa   :  { %v2360_v17 = vpop.eup %2359 }
 0x4fb   :  { %v1255_v33 = vadd.f32 1.0, %v2360_v17  ;;  %v3474_v17 = vld [vmem:[#allocation6 + $0x10] sm:$0xff] }
 0x4fc   :  { %v2362_v34 = vpop.eup %2361  ;;  %3655 = vst [vmem:[#allocation23_spill] sm:$0xff] %v3474_v17 }
 0x4fd   :  { %2363 = vrcp.f32 %v1255_v33  ;;  %v1262_v36 = vadd.f32 1.0, %v2362_v34 }
 0x4ff   :  { %2365 = vrcp.f32 %v1262_v36  ;;  %v3656_v36 = vld [vmem:[#allocation30_spill] sm:$0xff] }
 0x50a   :  { %v2364_v40 = vpop.eup %2363 }
 0x50b   :  { %v1266_v41 = vmul.f32 %v2364_v40, %v1265_v38 }
 0x50c   :  { %v2366_v47 = vpop.eup %2365 }
 0x50d   :  { %v1267_v45 = vadd.f32 %v1266_v41, %v3653_v43  ;;  %v1269_v48 = vsub.f32 1.0, %v2366_v47  ;;  %v1271_v53 = vmul.f32 %v2366_v47, %v3244_v59  ;;  %v3407_v59 = vld [vmem:[#allocation6 + $0x118] sm:$0xff] }
 0x50f   :  { %2367 = vtanh.f32 %v1267_v45  ;;  %v3657_v45 = vld [vmem:[#allocation31_spill] sm:$0xff] }
 0x51c   :  { %v2368_v49 = vpop.eup %2367 }
 0x51d   :  { %v1270_v51 = vmul.f32 %v2368_v49, %v1269_v48 }
 0x51f   :  { %v3379_v54 = vadd.f32 %v1271_v53, %v1270_v51 }
 0x521   :  { %1274 = vst [vmem:[#allocation8 + $0x20] sm:$0xff] %v3379_v54  ;;  %1346 = vmatmul.mubr.f32.vlgmr.msra.gmra.mxu0 %v3379_v54  ;;  %2237 = vmatmul.mubr.f32.vlgmr.msra.gmra.mxu1 %v3379_v54 }
 0x522   :  { %1453 = vmatpush1.msra.mxu0 %v3164_v18  ;;  %2240 = vmatpush3.msra.mxu1 %v3250_v14 }
 0x523   :  { %1454 = vmatprep.subr.mxu0 %v3168_v62  ;;  %2241 = vmatprep.subr.mxu1 %v3627_v52 }
 0x524   :  { %1455 = vmatpush1.msra.mxu0 %v3172_v39  ;;  %2242 = vmatpush3.msra.mxu1 %v3389_v55 }
 0x525   :  { %1456 = vmatprep.subr.mxu0 %v3257_v15  ;;  %2243 = vmatprep.subr.mxu1 %v3627_v52 }
 0x526   :  { %1457 = vmatpush1.msra.mxu0 %v3261_v37  ;;  %2244 = vmatpush3.msra.mxu1 %v3395_v56 }
 0x527   :  { %1458 = vmatprep.subr.mxu0 %v3265_v44  ;;  %2245 = vmatprep.subr.mxu1 %v3627_v52 }
 0x528   :  { %1459 = vmatpush1.msra.mxu0 %v3269_v21  ;;  %2246 = vmatpush3.msra.mxu1 %v3401_v63 }
 0x529   :  { %1460 = vmatprep.subr.mxu0 %v3273_v61  ;;  %2247 = vmatprep.subr.mxu1 %v3627_v52 }
 0x52a   :  { %1461 = vmatpush1.msra.mxu0 %v3277_v28  ;;  %2248 = vmatpush3.msra.mxu1 %v3407_v59 }
 0x52b   :  { %1462 = vmatprep.subr.mxu0 %v3281_v1  ;;  %2249 = vmatprep.subr.mxu1 %v3627_v52 }
 0x52c   :  { %1463 = vmatpush1.msra.mxu0 %v3285_v32  ;;  %2250 = vmatpush3.msra.mxu1 %v3413_v16 }
 0x52d   :  { %1464 = vmatprep.subr.mxu0 %v3289_v2  ;;  %2251 = vmatprep.subr.mxu1 %v3627_v52 }
 0x52e   :  { %1465 = vmatpush1.msra.mxu0 %v3293_v46  ;;  %2252 = vmatpush3.msra.mxu1 %v3419_v13 }
 0x52f   :  { %1466 = vmatprep.subr.mxu0 %v3297_v3  ;;  %2253 = vmatprep.subr.mxu1 %v3627_v52 }
 0x530   :  { %1467 = vmatpush1.msra.mxu0 %v3301_v50  ;;  %2254 = vmatpush3.msra.mxu1 %v3425_v25 }
 0x531   :  { %1468 = vmatprep.subr.mxu0 %v3305_v4  ;;  %2255 = vmatprep.subr.mxu1 %v3627_v52 }
 0x532   :  { %1469 = vmatpush1.msra.mxu0 %v3309_v42  ;;  %2256 = vmatpush3.msra.mxu1 %v3431_v20 }
 0x533   :  { %1470 = vmatprep.subr.mxu0 %v3313_v5  ;;  %2257 = vmatprep.subr.mxu1 %v3627_v52 }
 0x534   :  { %1471 = vmatpush1.msra.mxu0 %v3317_v35  ;;  %2258 = vmatpush3.msra.mxu1 %v3437_v22 }
 0x535   :  { %1472 = vmatprep.subr.mxu0 %v3321_v6  ;;  %2259 = vmatprep.subr.mxu1 %v3627_v52 }
 0x536   :  { %1473 = vmatpush1.msra.mxu0 %v3325_v11  ;;  %2260 = vmatpush3.msra.mxu1 %v3443_v24 }
 0x537   :  { %1474 = vmatprep.subr.mxu0 %v3329_v7  ;;  %2261 = vmatprep.subr.mxu1 %v3627_v52 }
 0x538   :  { %1475 = vmatpush1.msra.mxu0 %v3333_v0  ;;  %2262 = vmatpush3.msra.mxu1 %v3449_v26 }
 0x539   :  { %1476 = vmatprep.subr.mxu0 %v3337_v8  ;;  %2263 = vmatprep.subr.mxu1 %v3627_v52 }
 0x53a   :  { %1477 = vmatpush1.msra.mxu0 %v3341_v30  ;;  %2264 = vmatpush3.msra.mxu1 %v3455_v27 }
 0x53b   :  { %1478 = vmatprep.subr.mxu0 %v3345_v9  ;;  %2265 = vmatprep.subr.mxu1 %v3627_v52 }
 0x53c   :  { %1479 = vmatpush1.msra.mxu0 %v3349_v57  ;;  %2266 = vmatpush3.msra.mxu1 %v3461_v29 }
 0x53d   :  { %1480 = vmatprep.subr.mxu0 %v3353_v10  ;;  %2267 = vmatprep.subr.mxu1 %v3627_v52 }
 0x53e   :  { %1481 = vmatpush1.msra.mxu0 %v3357_v23  ;;  %2268 = vmatpush3.msra.mxu1 %v3467_v31  ;;  %v3658_v31 = vld [vmem:[#allocation38_spill] sm:$0xff] }
 0x53f   :  { %1482 = vmatprep.subr.mxu0 %v3361_v12  ;;  %2269 = vmatprep.subr.mxu1 %v3627_v52 }
 0x540   :  { %1483 = vmatpush1.msra.mxu0 %v3365_v60  ;;  %1516 = vmatprep.mubr.f32.mxu0 %v3627_v52 }
 0x541   :  { %2270 = vmatpush3.msra.mxu1 %v3474_v17  ;;  %2271 = vmatprep.mubr.msk.f32.mxu1 %vm2541_vm1, %v3627_v52 }
 0x542   :  { %1623 = vmatprep.subr.mxu0 %v3235_v19  ;;  %2274 = vmatprep.subr.mxu1 %v3627_v52 }
 0x5e1   :  { %v1347_v33 = vpop.f32.mrf.mxu0  ;;  %v1418_v34 = vpop.f32.mrf.mxu1 }
 0x5e2   :  { %v1422_v38 = vadd.f32 %v1347_v33, %v3656_v36  ;;  %v1436_v19 = vadd.f32 %v3001_v58, %v1418_v34  ;;  %v3659_v58 = vld [vmem:[#allocation22_spill] sm:$0xff] }
 0x5e3   :  { %v2238_v40 = vpop.f32.mrf.mxu1  ;;  %v1349_v43 = vpop.f32.mrf.mxu0 }
 0x5e4   :  { %v1855_v41 = vmul.f32 -1.442695, %v1422_v38  ;;  %v1429_v47 = vadd.f32 %v1349_v43, %v3657_v45 }
 0x5e6   :  { %2369 = vpow2.f32 %v1855_v41  ;;  %v1856_v48 = vmul.f32 -1.442695, %v1429_v47 }
 0x5e8   :  { %2371 = vpow2.f32 %v1856_v48 }
 0x5f3   :  { %v2370_v49 = vpop.eup %2369 }
 0x5f4   :  { %v1426_v51 = vadd.f32 1.0, %v2370_v49 }
 0x5f5   :  { %v2372_v53 = vpop.eup %2371 }
 0x5f6   :  { %2373 = vrcp.f32 %v1426_v51  ;;  %v1433_v17 = vadd.f32 1.0, %v2372_v53 }
 0x5f8   :  { %2375 = vrcp.f32 %v1433_v17 }
 0x603   :  { %v2374_v60 = vpop.eup %2373 }
 0x604   :  { %v1437_v12 = vmul.f32 %v2374_v60, %v1436_v19 }
 0x605   :  { %v2376_v36 = vpop.eup %2375 }
 0x606   :  { %v1438_v33 = vadd.f32 %v1437_v12, %v3658_v31  ;;  %v1440_v38 = vsub.f32 1.0, %v2376_v36  ;;  %v1442_v43 = vmul.f32 %v2376_v36, %v3379_v54  ;;  %v3666_v12 = vld [vmem:[#allocation34_spill] sm:$0xff] }
 0x608   :  { %2377 = vtanh.f32 %v1438_v33 }
 0x615   :  { %v2378_v40 = vpop.eup %2377 }
 0x616   :  { %v1441_v41 = vmul.f32 %v2378_v40, %v1440_v38 }
 0x618   :  { %v3486_v45 = vadd.f32 %v1442_v43, %v1441_v41 }
 0x61a   :  { %1445 = vst [vmem:[#allocation8 + $0x28] sm:$0xff] %v3486_v45  ;;  %1517 = vmatmul.mubr.f32.vlgmr.msra.gmra.mxu0 %v3486_v45  ;;  %2272 = vmatmul.mubr.f32.vlgmr.msra.gmra.mxu1 %v3486_v45 }
 0x61b   :  { %1624 = vmatpush1.msra.mxu0 %v3164_v18  ;;  %2275 = vmatpush3.msra.mxu1 %v3250_v14  ;;  %v3660_v18 = vld [vmem:[#allocation16_spill] sm:$0xff] }
 0x61c   :  { %1625 = vmatprep.subr.mxu0 %v3168_v62  ;;  %2276 = vmatprep.subr.mxu1 %v3627_v52  ;;  %v3661_v62 = vld [vmem:[#allocation17_spill] sm:$0xff] }
 0x61d   :  { %1626 = vmatpush1.msra.mxu0 %v3172_v39  ;;  %2277 = vmatpush3.msra.mxu1 %v3389_v55  ;;  %v3662_v39 = vld [vmem:[#allocation23_spill] sm:$0xff] }
 0x61e   :  { %1627 = vmatprep.subr.mxu0 %v3257_v15  ;;  %2278 = vmatprep.subr.mxu1 %v3627_v52 }
 0x61f   :  { %1628 = vmatpush1.msra.mxu0 %v3261_v37  ;;  %2279 = vmatpush3.msra.mxu1 %v3395_v56  ;;  %v3663_v37 = vld [vmem:[#allocation32_spill] sm:$0xff] }
 0x620   :  { %1629 = vmatprep.subr.mxu0 %v3265_v44  ;;  %2280 = vmatprep.subr.mxu1 %v3627_v52 }
 0x621   :  { %1630 = vmatpush1.msra.mxu0 %v3269_v21  ;;  %2281 = vmatpush3.msra.mxu1 %v3401_v63  ;;  %v3667_v63 = vld [vmem:[#allocation35_spill] sm:$0xff] }
 0x622   :  { %1631 = vmatprep.subr.mxu0 %v3273_v61  ;;  %2282 = vmatprep.subr.mxu1 %v3627_v52 }
 0x623   :  { %1632 = vmatpush1.msra.mxu0 %v3277_v28  ;;  %2283 = vmatpush3.msra.mxu1 %v3407_v59 }
 0x624   :  { %1633 = vmatprep.subr.mxu0 %v3281_v1  ;;  %2284 = vmatprep.subr.mxu1 %v3627_v52  ;;  %v3664_v1 = vld [vmem:[#allocation33_spill] sm:$0xff] }
 0x625   :  { %1634 = vmatpush1.msra.mxu0 %v3285_v32  ;;  %2285 = vmatpush3.msra.mxu1 %v3413_v16 }
 0x626   :  { %1635 = vmatprep.subr.mxu0 %v3289_v2  ;;  %2286 = vmatprep.subr.mxu1 %v3627_v52 }
 0x627   :  { %1636 = vmatpush1.msra.mxu0 %v3293_v46  ;;  %2287 = vmatpush3.msra.mxu1 %v3419_v13 }
 0x628   :  { %1637 = vmatprep.subr.mxu0 %v3297_v3  ;;  %2288 = vmatprep.subr.mxu1 %v3627_v52 }
 0x629   :  { %1638 = vmatpush1.msra.mxu0 %v3301_v50  ;;  %2289 = vmatpush3.msra.mxu1 %v3425_v25 }
 0x62a   :  { %1639 = vmatprep.subr.mxu0 %v3305_v4  ;;  %2290 = vmatprep.subr.mxu1 %v3627_v52 }
 0x62b   :  { %1640 = vmatpush1.msra.mxu0 %v3309_v42  ;;  %2291 = vmatpush3.msra.mxu1 %v3431_v20 }
 0x62c   :  { %1641 = vmatprep.subr.mxu0 %v3313_v5  ;;  %2292 = vmatprep.subr.mxu1 %v3627_v52 }
 0x62d   :  { %1642 = vmatpush1.msra.mxu0 %v3317_v35  ;;  %2293 = vmatpush3.msra.mxu1 %v3437_v22 }
 0x62e   :  { %1643 = vmatprep.subr.mxu0 %v3321_v6  ;;  %2294 = vmatprep.subr.mxu1 %v3627_v52  ;;  %v3665_v6 = vld [vmem:[#allocation41_spill] sm:$0xff] }
 0x62f   :  { %1644 = vmatpush1.msra.mxu0 %v3325_v11  ;;  %2295 = vmatpush3.msra.mxu1 %v3443_v24 }
 0x630   :  { %1645 = vmatprep.subr.mxu0 %v3329_v7  ;;  %2296 = vmatprep.subr.mxu1 %v3627_v52 }
 0x631   :  { %1646 = vmatpush1.msra.mxu0 %v3333_v0  ;;  %2297 = vmatpush3.msra.mxu1 %v3449_v26 }
 0x632   :  { %1647 = vmatprep.subr.mxu0 %v3337_v8  ;;  %2298 = vmatprep.subr.mxu1 %v3627_v52 }
 0x633   :  { %1648 = vmatpush1.msra.mxu0 %v3341_v30  ;;  %2299 = vmatpush3.msra.mxu1 %v3455_v27 }
 0x634   :  { %1649 = vmatprep.subr.mxu0 %v3345_v9  ;;  %2300 = vmatprep.subr.mxu1 %v3627_v52 }
 0x635   :  { %1650 = vmatpush1.msra.mxu0 %v3349_v57  ;;  %2301 = vmatpush3.msra.mxu1 %v3461_v29  ;;  %v3668_v29 = vld [vmem:[#allocation40_spill] sm:$0xff] }
 0x636   :  { %1651 = vmatprep.subr.mxu0 %v3353_v10  ;;  %2302 = vmatprep.subr.mxu1 %v3627_v52 }
 0x637   :  { %1652 = vmatpush1.msra.mxu0 %v3357_v23  ;;  %2303 = vmatpush3.msra.mxu1 %v3659_v58 }
 0x638   :  { %1653 = vmatprep.subr.mxu0 %v3660_v18  ;;  %2304 = vmatprep.subr.mxu1 %v3627_v52 }
 0x639   :  { %1654 = vmatpush1.msra.mxu0 %v3661_v62  ;;  %1687 = vmatprep.mubr.f32.mxu0 %v3627_v52 }
 0x63a   :  { %2305 = vmatpush3.msra.mxu1 %v3662_v39  ;;  %2306 = vmatprep.mubr.msk.f32.mxu1 %vm2541_vm1, %v3627_v52  ;;  %v2447_v52 = vld [vmem:[%s3577_s5] ss:$0 sm:$0xff]  ;;  %s2542_s5 = smov [#allocation8]  }
 0x63b   :  { %s1794_s29 = sshll.u32 %s2542_s5, 4  ;;  %s1795_s29 = int_to_ptr.vmem [resolvable:$true] %s1794_s29 }
 0x63c   :  { %s2488_s9 = scalar_lea.vmem %s1795_s29, 1024  ;;  %p2493_p11 = scmp.lt.s32.totalorder %s1795_s29, %s1795_s29 }
 0x63d   :  { %p2489_p10 = scmp.ne.s32.totalorder %s1795_s29, %s2488_s9  ;;  %p2494_p12 = scmp.lt.s32.totalorder %s2488_s9, %s2488_s9 }
 0x63f   :  { %p2495_p13 = por %p2494_p12, %p2493_p11 }
 0x641   :  { %p2496_p0 = pnand %p2495_p13, %p2489_p10 }
 0x6da   :  { %v1518_v14 = vpop.f32.mrf.mxu0  ;;  %v1589_v15 = vpop.f32.mrf.mxu1 }
 0x6db   :  { %v1593_v44 = vadd.f32 %v1518_v14, %v3663_v37  ;;  %v1607_v42 = vadd.f32 %v2447_v52, %v1589_v15 }
 0x6dc   :  { %v2273_v21 = vpop.f32.mrf.mxu1  ;;  %v1520_v28 = vpop.f32.mrf.mxu0 }
 0x6dd   :  { %v1857_v61 = vmul.f32 -1.442695, %v1593_v44  ;;  %v1600_v32 = vadd.f32 %v1520_v28, %v3664_v1 }
 0x6df   :  { %2379 = vpow2.f32 %v1857_v61  ;;  %v1858_v2 = vmul.f32 -1.442695, %v1600_v32 }
 0x6e1   :  { %2381 = vpow2.f32 %v1858_v2 }
 0x6ec   :  { %v2380_v46 = vpop.eup %2379 }
 0x6ed   :  { %v1597_v3 = vadd.f32 1.0, %v2380_v46 }
 0x6ee   :  { %v2382_v50 = vpop.eup %2381 }
 0x6ef   :  { %2383 = vrcp.f32 %v1597_v3  ;;  %v1604_v4 = vadd.f32 1.0, %v2382_v50 }
 0x6f1   :  { %2385 = vrcp.f32 %v1604_v4 }
 0x6fc   :  { %v2384_v5 = vpop.eup %2383 }
 0x6fd   :  { %v1608_v35 = vmul.f32 %v2384_v5, %v1607_v42 }
 0x6fe   :  { %v2386_v7 = vpop.eup %2385 }
 0x6ff   :  { %v1609_v11 = vadd.f32 %v1608_v35, %v3665_v6  ;;  %v1611_v0 = vsub.f32 1.0, %v2386_v7  ;;  %v1613_v9 = vmul.f32 %v2386_v7, %v3486_v45 }
 0x701   :  { %2387 = vtanh.f32 %v1609_v11 }
 0x70e   :  { %v2388_v8 = vpop.eup %2387 }
 0x70f   :  { %v1612_v30 = vmul.f32 %v2388_v8, %v1611_v0 }
 0x711   :  { %v1614_v57 = vadd.f32 %v1613_v9, %v1612_v30 }
 0x713   :  { %1616 = vst [vmem:[#allocation8 + $0x30] sm:$0xff] %v1614_v57  ;;  %1688 = vmatmul.mubr.f32.vlgmr.msra.gmra.mxu0 %v1614_v57  ;;  %2307 = vmatmul.mubr.f32.vlgmr.msra.gmra.mxu1 %v1614_v57 }
 0x7d3   :  { %v1689_v10 = vpop.f32.mrf.mxu0  ;;  %v1760_v23 = vpop.f32.mrf.mxu1 }
 0x7d4   :  { %v1764_v60 = vadd.f32 %v1689_v10, %v3666_v12  ;;  %v1778_v24 = vadd.f32 %v2447_v52, %v1760_v23 }
 0x7d5   :  { %v2308_v54 = vpop.f32.mrf.mxu1  ;;  %v1691_v56 = vpop.f32.mrf.mxu0 }
 0x7d6   :  { %v1859_v55 = vmul.f32 -1.442695, %v1764_v60  ;;  %v1771_v59 = vadd.f32 %v1691_v56, %v3667_v63 }
 0x7d8   :  { %2389 = vpow2.f32 %v1859_v55  ;;  %v1860_v16 = vmul.f32 -1.442695, %v1771_v59 }
 0x7da   :  { %2391 = vpow2.f32 %v1860_v16 }
 0x7e5   :  { %v2390_v13 = vpop.eup %2389 }
 0x7e6   :  { %v1768_v25 = vadd.f32 1.0, %v2390_v13 }
 0x7e7   :  { %v2392_v20 = vpop.eup %2391 }
 0x7e8   :  { %2393 = vrcp.f32 %v1768_v25  ;;  %v1775_v22 = vadd.f32 1.0, %v2392_v20 }
 0x7ea   :  { %2395 = vrcp.f32 %v1775_v22 }
 0x7f5   :  { %v2394_v26 = vpop.eup %2393 }
 0x7f6   :  { %v1779_v27 = vmul.f32 %v2394_v26, %v1778_v24 }
 0x7f7   :  { %v2396_v17 = vpop.eup %2395 }
 0x7f8   :  { %v1780_v31 = vadd.f32 %v1779_v27, %v3668_v29  ;;  %v1782_v34 = vsub.f32 1.0, %v2396_v17  ;;  %v1784_v49 = vmul.f32 %v2396_v17, %v1614_v57 }
 0x7fa   :  { %2397 = vtanh.f32 %v1780_v31 }
 0x807   :  { %v2398_v47 = vpop.eup %2397 }
 0x808   :  { %v1783_v48 = vmul.f32 %v2398_v47, %v1782_v34 }
 0x80a   :  { %v1785_v51 = vadd.f32 %v1784_v49, %v1783_v48 }
 0x80c   :  { %1787 = vst [vmem:[#allocation8 + $0x38] sm:$0xff] %v1785_v51  ;;  %1788 = vst [vmem:[#allocation9] sm:$0xff] %v1785_v51 }
 0x80d   :  { %2499 = shalt.err (!%p2496_p0)
}
 0x80e   :  { %s2544_s10 = smov 128   ;;  %s2545_s11 = smov 8  }
 0x80f   :  { %1800 = dma.vmem_to_hbm [thread:$0]  %s1795_s29, 1024, %s3578_s6, [#allocation5], %s2544_s10, %s2544_s10, %s2545_s11  }
 0x810   :  { %s2508_s13 = scalar_lea.vmem %s1808_s8, 128  ;;  %p2513_p2 = scmp.lt.s32.totalorder %s1808_s8, %s1808_s8 }
 0x811   :  { %p2509_p1 = scmp.ne.s32.totalorder %s1808_s8, %s2508_s13  ;;  %p2514_p3 = scmp.lt.s32.totalorder %s2508_s13, %s2508_s13 }
 0x813   :  { %p2515_p4 = por %p2514_p3, %p2513_p2 }
 0x815   :  { %p2516_p5 = pnand %p2515_p4, %p2509_p1 }
 0x817   :  { %2519 = shalt.err (!%p2516_p5)
}
 0x818   :  { %1810 = dma.vmem_to_hbm [thread:$0]  %s1808_s8, 128, %s3579_s7, [#allocation10]  }
 0x819   :  { %2532 = dma.done.wait [#allocation5], 1024  }
 0x81a   :  { %2533 = vsyncadd [#allocation5], 4294966272 }
 0x81b   :  { %2534 = dma.done.wait [#allocation10], 128  }
 0x81c   :  { %2535 = vsyncadd [#allocation10], 4294967168 }
 0x81d   :  { %1817 = vsyncpa [#allocation4], 1 }
 0x81e   :  { %1818 = vsyncpa [#allocation7], 1 }
 0x81f   :  { %1819 = vsyncpa [#allocation5], 1 }
 0x820   :  { %1820 = vsyncpa [#allocation10], 1 }

</bundles_post_ra>
